<compile_context>
chip_gen: v7x
topology: tpu7x:2x2x1
jax: 0.10.0
libtpu: 0.0.40
codegen_flags: <defaults>
</compile_context>

<pallas_src>
import functools

import jax
import jax.numpy as jnp
from jax.experimental import pallas as pl
from jax.experimental.pallas import tpu as pltpu

IMAGE_FEATURES = 1280
NUM_FEATURES = 8
NUM_CLASSES = 2
HIDDEN1 = 512
HIDDEN2 = 256
NUM_HEADS = 5  # asymmetry, border, color, diameter, evolution
HEAD_PAD = 128  # lane-dense width of the fused (classifier + heads) output slab
_HEAD_NAMES = ("asymmetry", "border", "color", "diameter", "evolution")


def _model_kernel(image_ref, feat_ref,
                  proj_w_ref, proj_b_ref,
                  w1_img_ref, w1_feat_ref, b1_ref,
                  w2_ref, b2_ref,
                  hc_w_ref, hc_b_ref,
                  out_ref):
    # ---------------- backbone stub ----------------
    # TODO(synk): the full EfficientNet-B0 backbone has no compact Pallas
    # equivalent; global-average-pool + Linear(3 -> 1280) stands in so the
    # 1280-dim feature interface of the rest of the model is exact.
    C = proj_w_ref.shape[0]
    hw = image_ref.shape[1] // C
    inv_hw = 1.0 / float(hw)

    # Image block is lane-dense [TB, C*H*W] bf16.  One lane-axis reduction per
    # channel (static lane-offset ref slice; cheap when H*W % 128 == 0), with
    # f32 accumulation, then the K=C projection as C VPU broadcast FMAs
    # (avoids a 97%-padded MXU pass).
    img_feat = proj_b_ref[...]                                   # [1, 1280] f32
    for c in range(C):
        ch = image_ref[:, c * hw:(c + 1) * hw]                   # [TB, HW] bf16
        s_c = jnp.sum(ch, axis=1, keepdims=True,
                      dtype=jnp.float32)                         # [TB, 1] f32
        img_feat = img_feat + (s_c * inv_hw) * proj_w_ref[c:c + 1, :]
    # img_feat: [TB, 1280] f32

    # ---------------- fusion layer ----------------
    # Linear(1288->512) + ReLU + Dropout(id) + Linear(512->256) + ReLU + Dropout(id)
    h1 = jnp.dot(img_feat.astype(jnp.bfloat16), w1_img_ref[...],
                 preferred_element_type=jnp.float32)             # [TB, 512] f32
    feat = feat_ref[...]                                         # [TB, 8] f32
    w1f = w1_feat_ref[...]                                       # [8, 512] f32
    for j in range(NUM_FEATURES):                                # K=8 -> VPU FMAs
        h1 = h1 + feat[:, j:j + 1] * w1f[j:j + 1, :]
    h1 = jnp.maximum(h1 + b1_ref[...], 0.0)                      # [TB, 512] f32

    h2 = (jnp.dot(h1.astype(jnp.bfloat16), w2_ref[...],
                  preferred_element_type=jnp.float32)
          + b2_ref[...])
    fused = jnp.maximum(h2, 0.0)                                 # [TB, 256] f32

    # -------- fused classifier + 5 attribute heads (lane-dense [TB,128]) -----
    z = (jnp.dot(fused.astype(jnp.bfloat16), hc_w_ref[...],
                 preferred_element_type=jnp.float32)
         + hc_b_ref[...])                                        # [TB, 128] f32
    col = jax.lax.broadcasted_iota(jnp.int32, z.shape, 1)
    is_head = (col >= NUM_CLASSES) & (col < NUM_CLASSES + NUM_HEADS)
    out_ref[...] = jnp.where(is_head, jax.nn.sigmoid(z), z)


def _linear_params(key, out_features, in_features):
    """PyTorch nn.Linear-style uniform init (deterministic given key)."""
    kw, kb = jax.random.split(key)
    bound = 1.0 / jnp.sqrt(jnp.float32(in_features))
    w = jax.random.uniform(kw, (out_features, in_features), jnp.float32, -bound, bound)
    b = jax.random.uniform(kb, (out_features,), jnp.float32, -bound, bound)
    return w, b


def init_params(seed=0):
    key = jax.random.PRNGKey(seed)
    keys = jax.random.split(key, 10)
    params = {}
    # backbone stub projection: [3 -> 1280]
    params["proj_w"], params["proj_b"] = _linear_params(keys[0], IMAGE_FEATURES, 3)
    # fusion layer
    params["fc1_w"], params["fc1_b"] = _linear_params(
        keys[1], HIDDEN1, IMAGE_FEATURES + NUM_FEATURES)         # [512, 1288]
    params["fc2_w"], params["fc2_b"] = _linear_params(keys[2], HIDDEN2, HIDDEN1)
    # attribute heads (each Linear(256, 1))
    head_ws, head_bs = [], []
    for i, _name in enumerate(_HEAD_NAMES):
        w, b = _linear_params(keys[3 + i], 1, HIDDEN2)
        head_ws.append(w)
        head_bs.append(b)
    params["heads_w"] = jnp.concatenate(head_ws, axis=0)         # [5, 256]
    params["heads_b"] = jnp.concatenate(head_bs, axis=0)         # [5]
    # classifier
    params["cls_w"], params["cls_b"] = _linear_params(keys[8], NUM_CLASSES, HIDDEN2)
    # NOTE: segmentation_head params are unused in forward() and therefore omitted.
    return params


def prepare_params(params):
    """One-time layout / dtype preparation (outside the per-call jit path):
    transpose to [in, out], cast the MXU weights (fc1-img, fc2, fused heads) to
    bf16, keep the VPU-path weights (projection, fc1-feat, biases) in f32, and
    fuse the classifier + 5 attribute heads into one lane-padded [256, 128]
    weight."""
    fc1_w = params["fc1_w"].T                                    # [1288, 512]
    hc_w = jnp.zeros((HIDDEN2, HEAD_PAD), jnp.float32)
    hc_w = hc_w.at[:, :NUM_CLASSES].set(params["cls_w"].T)
    hc_w = hc_w.at[:, NUM_CLASSES:NUM_CLASSES + NUM_HEADS].set(params["heads_w"].T)
    hc_b = jnp.zeros((1, HEAD_PAD), jnp.float32)
    hc_b = hc_b.at[:, :NUM_CLASSES].set(params["cls_b"][None, :])
    hc_b = hc_b.at[:, NUM_CLASSES:NUM_CLASSES + NUM_HEADS].set(params["heads_b"][None, :])
    return {
        "proj_w": params["proj_w"].T,                            # [3, 1280] f32 (VPU)
        "proj_b": params["proj_b"].reshape(1, IMAGE_FEATURES),   # [1, 1280] f32
        "w1_img": fc1_w[:IMAGE_FEATURES, :].astype(jnp.bfloat16),    # [1280, 512]
        "w1_feat": fc1_w[IMAGE_FEATURES:, :],                    # [8, 512] f32 (VPU)
        "b1": params["fc1_b"].reshape(1, HIDDEN1),
        "w2": params["fc2_w"].T.astype(jnp.bfloat16),            # [512, 256]
        "b2": params["fc2_b"].reshape(1, HIDDEN2),
        "hc_w": hc_w.astype(jnp.bfloat16),                       # [256, 128] bf16
        "hc_b": hc_b,                                            # [1, 128] f32
    }


@functools.partial(jax.jit, static_argnames=("block_b",))
def enhanced_skin_lesion_forward(image, features, prepared, *, block_b=16):
    """image: [B, 3, H, W] float32 (NCHW); features: [B, 8] float32.
    block_b: batch tile (multiple of 8; 16-32 recommended — the kernel is
    HBM-bound so larger tiles only amortize per-step overhead, and 224x224
    bf16 tiles of 16 samples stay well inside v7x's 64 MiB VMEM).  On v7x,
    pick block_b so that cdiv(B, block_b) is even to balance the 2 TCs."""
    B, C, H, W = image.shape
    hw = H * W
    # Lane-dense, half-width image: metadata-only reshape of contiguous NCHW,
    # then one bf16 cast (halves HBM image bytes — the dominant cost).
    img_flat = image.astype(jnp.bfloat16).reshape(B, C * hw)     # [B, C*H*W] bf16
    feats = features.astype(jnp.float32)

    grid_b = pl.cdiv(B, block_b)
    Bp = grid_b * block_b
    if Bp != B:
        img_flat = jnp.pad(img_flat, ((0, Bp - B), (0, 0)))
        feats = jnp.pad(feats, ((0, Bp - B), (0, 0)))

    def resident(arr):
        nd = arr.ndim
        return pl.BlockSpec(arr.shape, lambda i, _nd=nd: (0,) * _nd)

    out = pl.pallas_call(
        _model_kernel,
        out_shape=jax.ShapeDtypeStruct((Bp, HEAD_PAD), jnp.float32),
        grid_spec=pltpu.PrefetchScalarGridSpec(
            num_scalar_prefetch=0,
            grid=(grid_b,),
            in_specs=[
                pl.BlockSpec((block_b, C * hw), lambda i: (i, 0)),       # image tile
                pl.BlockSpec((block_b, NUM_FEATURES), lambda i: (i, 0)), # feature tile
                resident(prepared["proj_w"]),
                resident(prepared["proj_b"]),
                resident(prepared["w1_img"]),
                resident(prepared["w1_feat"]),
                resident(prepared["b1"]),
                resident(prepared["w2"]),
                resident(prepared["b2"]),
                resident(prepared["hc_w"]),
                resident(prepared["hc_b"]),
            ],
            out_specs=pl.BlockSpec((block_b, HEAD_PAD), lambda i: (i, 0)),
        ),
        compiler_params=pltpu.CompilerParams(
            dimension_semantics=("parallel",),        # batch axis shardable on v7x
            vmem_limit_bytes=48 * 1024 * 1024,        # headroom beyond 32 MiB default,
                                                      # still under v7x's 64 MiB VMEM
        ),
    )(img_flat, feats,
      prepared["proj_w"], prepared["proj_b"],
      prepared["w1_img"], prepared["w1_feat"], prepared["b1"],
      prepared["w2"], prepared["b2"],
      prepared["hc_w"], prepared["hc_b"])

    out = out[:B]
    result = {"classification": out[:, :NUM_CLASSES]}            # [B, 2] logits
    for j, name in enumerate(_HEAD_NAMES):
        result[name] = out[:, NUM_CLASSES + j:NUM_CLASSES + j + 1]   # [B, 1] sigmoid
    return result


if __name__ == "__main__":
    key = jax.random.PRNGKey(0)
    k_img, k_feat = jax.random.split(key)

    # Small but representative shapes: B=12 with block_b=8 exercises both the
    # batch-padding path (12 -> 16) and a multi-step (2-tile) batch grid.
    B, C, H, W = 12, 3, 32, 32
    image = jax.random.normal(k_img, (B, C, H, W), jnp.float32)       # NCHW
    features = jax.random.normal(k_feat, (B, NUM_FEATURES), jnp.float32)

    params = init_params(seed=0)
    prepared = prepare_params(params)

    out = enhanced_skin_lesion_forward(image, features, prepared, block_b=8)
    jax.block_until_ready(out)

    assert out["classification"].shape == (B, NUM_CLASSES)
    for name in _HEAD_NAMES:
        v = out[name]
        assert v.shape == (B, 1)
        assert bool(jnp.all((v >= 0.0) & (v <= 1.0)))
    assert bool(jnp.all(jnp.isfinite(out["classification"])))

    print("KERNEL_OK")
</pallas_src>

<mosaic_0001>
module attributes {stable_mosaic.version = 11 : i64} {
  func.func @_model_kernel(%arg0: i32, %arg1: memref<8x3072xbf16, #tpu.memory_space<vmem>>, %arg2: memref<8x8xf32, #tpu.memory_space<vmem>>, %arg3: memref<3x1280xf32, #tpu.memory_space<vmem>>, %arg4: memref<1x1280xf32, #tpu.memory_space<vmem>>, %arg5: memref<1280x512xbf16, #tpu.memory_space<vmem>>, %arg6: memref<8x512xf32, #tpu.memory_space<vmem>>, %arg7: memref<1x512xf32, #tpu.memory_space<vmem>>, %arg8: memref<512x256xbf16, #tpu.memory_space<vmem>>, %arg9: memref<1x256xf32, #tpu.memory_space<vmem>>, %arg10: memref<256x128xbf16, #tpu.memory_space<vmem>>, %arg11: memref<1x128xf32, #tpu.memory_space<vmem>>, %arg12: memref<8x128xf32, #tpu.memory_space<vmem>>) attributes {dimension_semantics = [#tpu.dimension_semantics<parallel>], iteration_bounds = array<i64: 2>, scalar_prefetch = 0 : i64, scratch_operands = 0 : i64, tpu.core_type = #tpu.core_type<tc>, window_params = [{transform_indices = @transform_0, window_bounds = array<i64: 8, 3072>}, {transform_indices = @transform_1, window_bounds = array<i64: 8, 8>}, {pipeline_mode = #tpu.pipeline_mode<synchronous>, transform_indices = @transform_2, window_bounds = array<i64: 3, 1280>}, {pipeline_mode = #tpu.pipeline_mode<synchronous>, transform_indices = @transform_3, window_bounds = array<i64: 1, 1280>}, {pipeline_mode = #tpu.pipeline_mode<synchronous>, transform_indices = @transform_4, window_bounds = array<i64: 1280, 512>}, {pipeline_mode = #tpu.pipeline_mode<synchronous>, transform_indices = @transform_5, window_bounds = array<i64: 8, 512>}, {pipeline_mode = #tpu.pipeline_mode<synchronous>, transform_indices = @transform_6, window_bounds = array<i64: 1, 512>}, {pipeline_mode = #tpu.pipeline_mode<synchronous>, transform_indices = @transform_7, window_bounds = array<i64: 512, 256>}, {pipeline_mode = #tpu.pipeline_mode<synchronous>, transform_indices = @transform_8, window_bounds = array<i64: 1, 256>}, {pipeline_mode = #tpu.pipeline_mode<synchronous>, transform_indices = @transform_9, window_bounds = array<i64: 256, 128>}, {pipeline_mode = #tpu.pipeline_mode<synchronous>, transform_indices = @transform_10, window_bounds = array<i64: 1, 128>}, {transform_indices = @transform_11, window_bounds = array<i64: 8, 128>}]} {
    %c0 = arith.constant 0 : index
    %c0_0 = arith.constant 0 : index
    %0 = vector.load %arg4[%c0, %c0_0] : memref<1x1280xf32, #tpu.memory_space<vmem>>, vector<1x1280xf32>
    %c0_1 = arith.constant 0 : index
    %c0_2 = arith.constant 0 : index
    %1 = vector.load %arg1[%c0_1, %c0_2] : memref<8x3072xbf16, #tpu.memory_space<vmem>>, vector<8x1024xbf16>
    %2 = arith.extf %1 : vector<8x1024xbf16> to vector<8x1024xf32>
    %cst = arith.constant dense<0.000000e+00> : vector<8xf32>
    %3 = vector.multi_reduction <add>, %2, %cst [1] : vector<8x1024xf32> to vector<8xf32>
    %4 = vector.shape_cast %3 : vector<8xf32> to vector<8x1xf32>
    %cst_3 = arith.constant 9.765625E-4 : f32
    %5 = vector.broadcast %cst_3 : f32 to vector<8x1xf32>
    %6 = arith.mulf %4, %5 : vector<8x1xf32>
    %c0_4 = arith.constant 0 : index
    %c0_5 = arith.constant 0 : index
    %7 = vector.load %arg3[%c0_4, %c0_5] : memref<3x1280xf32, #tpu.memory_space<vmem>>, vector<1x1280xf32>
    %8 = vector.broadcast %6 : vector<8x1xf32> to vector<8x1280xf32>
    %9 = vector.broadcast %7 : vector<1x1280xf32> to vector<8x1280xf32>
    %10 = arith.mulf %8, %9 : vector<8x1280xf32>
    %11 = vector.broadcast %0 : vector<1x1280xf32> to vector<8x1280xf32>
    %12 = arith.addf %11, %10 : vector<8x1280xf32>
    %c0_6 = arith.constant 0 : index
    %c1024 = arith.constant 1024 : index
    %13 = vector.load %arg1[%c0_6, %c1024] : memref<8x3072xbf16, #tpu.memory_space<vmem>>, vector<8x1024xbf16>
    %14 = arith.extf %13 : vector<8x1024xbf16> to vector<8x1024xf32>
    %cst_7 = arith.constant dense<0.000000e+00> : vector<8xf32>
    %15 = vector.multi_reduction <add>, %14, %cst_7 [1] : vector<8x1024xf32> to vector<8xf32>
    %16 = vector.shape_cast %15 : vector<8xf32> to vector<8x1xf32>
    %cst_8 = arith.constant 9.765625E-4 : f32
    %17 = vector.broadcast %cst_8 : f32 to vector<8x1xf32>
    %18 = arith.mulf %16, %17 : vector<8x1xf32>
    %c1 = arith.constant 1 : index
    %c0_9 = arith.constant 0 : index
    %19 = vector.load %arg3[%c1, %c0_9] : memref<3x1280xf32, #tpu.memory_space<vmem>>, vector<1x1280xf32>
    %20 = vector.broadcast %18 : vector<8x1xf32> to vector<8x1280xf32>
    %21 = vector.broadcast %19 : vector<1x1280xf32> to vector<8x1280xf32>
    %22 = arith.mulf %20, %21 : vector<8x1280xf32>
    %23 = arith.addf %12, %22 : vector<8x1280xf32>
    %c0_10 = arith.constant 0 : index
    %c2048 = arith.constant 2048 : index
    %24 = vector.load %arg1[%c0_10, %c2048] : memref<8x3072xbf16, #tpu.memory_space<vmem>>, vector<8x1024xbf16>
    %25 = arith.extf %24 : vector<8x1024xbf16> to vector<8x1024xf32>
    %cst_11 = arith.constant dense<0.000000e+00> : vector<8xf32>
    %26 = vector.multi_reduction <add>, %25, %cst_11 [1] : vector<8x1024xf32> to vector<8xf32>
    %27 = vector.shape_cast %26 : vector<8xf32> to vector<8x1xf32>
    %cst_12 = arith.constant 9.765625E-4 : f32
    %28 = vector.broadcast %cst_12 : f32 to vector<8x1xf32>
    %29 = arith.mulf %27, %28 : vector<8x1xf32>
    %c2 = arith.constant 2 : index
    %c0_13 = arith.constant 0 : index
    %30 = vector.load %arg3[%c2, %c0_13] : memref<3x1280xf32, #tpu.memory_space<vmem>>, vector<1x1280xf32>
    %31 = vector.broadcast %29 : vector<8x1xf32> to vector<8x1280xf32>
    %32 = vector.broadcast %30 : vector<1x1280xf32> to vector<8x1280xf32>
    %33 = arith.mulf %31, %32 : vector<8x1280xf32>
    %34 = arith.addf %23, %33 : vector<8x1280xf32>
    %35 = arith.truncf %34 : vector<8x1280xf32> to vector<8x1280xbf16>
    %c0_14 = arith.constant 0 : index
    %c0_15 = arith.constant 0 : index
    %36 = vector.load %arg5[%c0_14, %c0_15] : memref<1280x512xbf16, #tpu.memory_space<vmem>>, vector<1280x512xbf16>
    %cst_16 = arith.constant dense<0.000000e+00> : vector<8x512xf32>
    %37 = tpu.matmul %35, %36, %cst_16 {dimension_numbers = #tpu.dot_dimension_numbers<[1], [0], [0], [1], [0, 0, 1, 1], [], []>} : vector<8x1280xbf16>, vector<1280x512xbf16>, vector<8x512xf32> -> vector<8x512xf32>
    %c0_17 = arith.constant 0 : index
    %c0_18 = arith.constant 0 : index
    %38 = vector.load %arg2[%c0_17, %c0_18] : memref<8x8xf32, #tpu.memory_space<vmem>>, vector<8x8xf32>
    %c0_19 = arith.constant 0 : index
    %c0_20 = arith.constant 0 : index
    %39 = vector.load %arg6[%c0_19, %c0_20] : memref<8x512xf32, #tpu.memory_space<vmem>>, vector<8x512xf32>
    %40 = vector.extract_strided_slice %38 {offsets = [0, 0], sizes = [8, 1], strides = [1, 1]} : vector<8x8xf32> to vector<8x1xf32>
    %41 = vector.extract_strided_slice %39 {offsets = [0, 0], sizes = [1, 512], strides = [1, 1]} : vector<8x512xf32> to vector<1x512xf32>
    %42 = vector.broadcast %40 : vector<8x1xf32> to vector<8x512xf32>
    %43 = vector.broadcast %41 : vector<1x512xf32> to vector<8x512xf32>
    %44 = arith.mulf %42, %43 : vector<8x512xf32>
    %45 = arith.addf %37, %44 : vector<8x512xf32>
    %46 = vector.extract_strided_slice %38 {offsets = [0, 1], sizes = [8, 1], strides = [1, 1]} : vector<8x8xf32> to vector<8x1xf32>
    %47 = vector.extract_strided_slice %39 {offsets = [1, 0], sizes = [1, 512], strides = [1, 1]} : vector<8x512xf32> to vector<1x512xf32>
    %48 = vector.broadcast %46 : vector<8x1xf32> to vector<8x512xf32>
    %49 = vector.broadcast %47 : vector<1x512xf32> to vector<8x512xf32>
    %50 = arith.mulf %48, %49 : vector<8x512xf32>
    %51 = arith.addf %45, %50 : vector<8x512xf32>
    %52 = vector.extract_strided_slice %38 {offsets = [0, 2], sizes = [8, 1], strides = [1, 1]} : vector<8x8xf32> to vector<8x1xf32>
    %53 = vector.extract_strided_slice %39 {offsets = [2, 0], sizes = [1, 512], strides = [1, 1]} : vector<8x512xf32> to vector<1x512xf32>
    %54 = vector.broadcast %52 : vector<8x1xf32> to vector<8x512xf32>
    %55 = vector.broadcast %53 : vector<1x512xf32> to vector<8x512xf32>
    %56 = arith.mulf %54, %55 : vector<8x512xf32>
    %57 = arith.addf %51, %56 : vector<8x512xf32>
    %58 = vector.extract_strided_slice %38 {offsets = [0, 3], sizes = [8, 1], strides = [1, 1]} : vector<8x8xf32> to vector<8x1xf32>
    %59 = vector.extract_strided_slice %39 {offsets = [3, 0], sizes = [1, 512], strides = [1, 1]} : vector<8x512xf32> to vector<1x512xf32>
    %60 = vector.broadcast %58 : vector<8x1xf32> to vector<8x512xf32>
    %61 = vector.broadcast %59 : vector<1x512xf32> to vector<8x512xf32>
    %62 = arith.mulf %60, %61 : vector<8x512xf32>
    %63 = arith.addf %57, %62 : vector<8x512xf32>
    %64 = vector.extract_strided_slice %38 {offsets = [0, 4], sizes = [8, 1], strides = [1, 1]} : vector<8x8xf32> to vector<8x1xf32>
    %65 = vector.extract_strided_slice %39 {offsets = [4, 0], sizes = [1, 512], strides = [1, 1]} : vector<8x512xf32> to vector<1x512xf32>
    %66 = vector.broadcast %64 : vector<8x1xf32> to vector<8x512xf32>
    %67 = vector.broadcast %65 : vector<1x512xf32> to vector<8x512xf32>
    %68 = arith.mulf %66, %67 : vector<8x512xf32>
    %69 = arith.addf %63, %68 : vector<8x512xf32>
    %70 = vector.extract_strided_slice %38 {offsets = [0, 5], sizes = [8, 1], strides = [1, 1]} : vector<8x8xf32> to vector<8x1xf32>
    %71 = vector.extract_strided_slice %39 {offsets = [5, 0], sizes = [1, 512], strides = [1, 1]} : vector<8x512xf32> to vector<1x512xf32>
    %72 = vector.broadcast %70 : vector<8x1xf32> to vector<8x512xf32>
    %73 = vector.broadcast %71 : vector<1x512xf32> to vector<8x512xf32>
    %74 = arith.mulf %72, %73 : vector<8x512xf32>
    %75 = arith.addf %69, %74 : vector<8x512xf32>
    %76 = vector.extract_strided_slice %38 {offsets = [0, 6], sizes = [8, 1], strides = [1, 1]} : vector<8x8xf32> to vector<8x1xf32>
    %77 = vector.extract_strided_slice %39 {offsets = [6, 0], sizes = [1, 512], strides = [1, 1]} : vector<8x512xf32> to vector<1x512xf32>
    %78 = vector.broadcast %76 : vector<8x1xf32> to vector<8x512xf32>
    %79 = vector.broadcast %77 : vector<1x512xf32> to vector<8x512xf32>
    %80 = arith.mulf %78, %79 : vector<8x512xf32>
    %81 = arith.addf %75, %80 : vector<8x512xf32>
    %82 = vector.extract_strided_slice %38 {offsets = [0, 7], sizes = [8, 1], strides = [1, 1]} : vector<8x8xf32> to vector<8x1xf32>
    %83 = vector.extract_strided_slice %39 {offsets = [7, 0], sizes = [1, 512], strides = [1, 1]} : vector<8x512xf32> to vector<1x512xf32>
    %84 = vector.broadcast %82 : vector<8x1xf32> to vector<8x512xf32>
    %85 = vector.broadcast %83 : vector<1x512xf32> to vector<8x512xf32>
    %86 = arith.mulf %84, %85 : vector<8x512xf32>
    %87 = arith.addf %81, %86 : vector<8x512xf32>
    %c0_21 = arith.constant 0 : index
    %c0_22 = arith.constant 0 : index
    %88 = vector.load %arg7[%c0_21, %c0_22] : memref<1x512xf32, #tpu.memory_space<vmem>>, vector<1x512xf32>
    %89 = vector.broadcast %88 : vector<1x512xf32> to vector<8x512xf32>
    %90 = arith.addf %87, %89 : vector<8x512xf32>
    %cst_23 = arith.constant 0.000000e+00 : f32
    %91 = vector.broadcast %cst_23 : f32 to vector<8x512xf32>
    %92 = arith.maximumf %90, %91 : vector<8x512xf32>
    %93 = arith.truncf %92 : vector<8x512xf32> to vector<8x512xbf16>
    %c0_24 = arith.constant 0 : index
    %c0_25 = arith.constant 0 : index
    %94 = vector.load %arg8[%c0_24, %c0_25] : memref<512x256xbf16, #tpu.memory_space<vmem>>, vector<512x256xbf16>
    %cst_26 = arith.constant dense<0.000000e+00> : vector<8x256xf32>
    %95 = tpu.matmul %93, %94, %cst_26 {dimension_numbers = #tpu.dot_dimension_numbers<[1], [0], [0], [1], [0, 0, 1, 1], [], []>} : vector<8x512xbf16>, vector<512x256xbf16>, vector<8x256xf32> -> vector<8x256xf32>
    %c0_27 = arith.constant 0 : index
    %c0_28 = arith.constant 0 : index
    %96 = vector.load %arg9[%c0_27, %c0_28] : memref<1x256xf32, #tpu.memory_space<vmem>>, vector<1x256xf32>
    %97 = vector.broadcast %96 : vector<1x256xf32> to vector<8x256xf32>
    %98 = arith.addf %95, %97 : vector<8x256xf32>
    %cst_29 = arith.constant 0.000000e+00 : f32
    %99 = vector.broadcast %cst_29 : f32 to vector<8x256xf32>
    %100 = arith.maximumf %98, %99 : vector<8x256xf32>
    %101 = arith.truncf %100 : vector<8x256xf32> to vector<8x256xbf16>
    %c0_30 = arith.constant 0 : index
    %c0_31 = arith.constant 0 : index
    %102 = vector.load %arg10[%c0_30, %c0_31] : memref<256x128xbf16, #tpu.memory_space<vmem>>, vector<256x128xbf16>
    %cst_32 = arith.constant dense<0.000000e+00> : vector<8x128xf32>
    %103 = tpu.matmul %101, %102, %cst_32 {dimension_numbers = #tpu.dot_dimension_numbers<[1], [0], [0], [1], [0, 0, 1, 1], [], []>} : vector<8x256xbf16>, vector<256x128xbf16>, vector<8x128xf32> -> vector<8x128xf32>
    %c0_33 = arith.constant 0 : index
    %c0_34 = arith.constant 0 : index
    %104 = vector.load %arg11[%c0_33, %c0_34] : memref<1x128xf32, #tpu.memory_space<vmem>>, vector<1x128xf32>
    %105 = vector.broadcast %104 : vector<1x128xf32> to vector<8x128xf32>
    %106 = arith.addf %103, %105 : vector<8x128xf32>
    %107 = tpu.iota {dimensions = array<i32: 1>} : vector<8x128xi32>
    %c2_i32 = arith.constant 2 : i32
    %108 = vector.broadcast %c2_i32 : i32 to vector<8x128xi32>
    %109 = arith.cmpi sge, %107, %108 : vector<8x128xi32>
    %c7_i32 = arith.constant 7 : i32
    %110 = vector.broadcast %c7_i32 : i32 to vector<8x128xi32>
    %111 = arith.cmpi slt, %107, %110 : vector<8x128xi32>
    %112 = arith.andi %109, %111 : vector<8x128xi1>
    %113 = arith.negf %106 : vector<8x128xf32>
    %114 = math.exp %113 : vector<8x128xf32>
    %cst_35 = arith.constant 1.000000e+00 : f32
    %115 = vector.broadcast %cst_35 : f32 to vector<8x128xf32>
    %116 = arith.addf %115, %114 : vector<8x128xf32>
    %117 = arith.divf %115, %116 : vector<8x128xf32>
    %118 = arith.select %112, %117, %106 : vector<8x128xi1>, vector<8x128xf32>
    %c0_36 = arith.constant 0 : index
    %c0_37 = arith.constant 0 : index
    %119 = vector.load %arg12[%c0_36, %c0_37] : memref<8x128xf32, #tpu.memory_space<vmem>>, vector<8x128xf32>
    tpu.vector_store %arg12[%c0_36, %c0_37], %118 {strides = array<i32>} : memref<8x128xf32, #tpu.memory_space<vmem>>, vector<8x128xf32>,
    return
  }
  func.func @transform_0(%arg0: i32) -> (i32, i32) {
    %c0_i32 = arith.constant 0 : i32
    %c0_i32_0 = arith.constant 0 : i32
    return %arg0, %c0_i32 : i32, i32
  }
  func.func @transform_1(%arg0: i32) -> (i32, i32) {
    %c0_i32 = arith.constant 0 : i32
    %c0_i32_0 = arith.constant 0 : i32
    return %arg0, %c0_i32 : i32, i32
  }
  func.func @transform_2(%arg0: i32) -> (i32, i32) {
    %c0_i32 = arith.constant 0 : i32
    %c0_i32_0 = arith.constant 0 : i32
    %c0_i32_1 = arith.constant 0 : i32
    return %c0_i32, %c0_i32_0 : i32, i32
  }
  func.func @transform_3(%arg0: i32) -> (i32, i32) {
    %c0_i32 = arith.constant 0 : i32
    %c0_i32_0 = arith.constant 0 : i32
    %c0_i32_1 = arith.constant 0 : i32
    return %c0_i32, %c0_i32_0 : i32, i32
  }
  func.func @transform_4(%arg0: i32) -> (i32, i32) {
    %c0_i32 = arith.constant 0 : i32
    %c0_i32_0 = arith.constant 0 : i32
    %c0_i32_1 = arith.constant 0 : i32
    return %c0_i32, %c0_i32_0 : i32, i32
  }
  func.func @transform_5(%arg0: i32) -> (i32, i32) {
    %c0_i32 = arith.constant 0 : i32
    %c0_i32_0 = arith.constant 0 : i32
    %c0_i32_1 = arith.constant 0 : i32
    return %c0_i32, %c0_i32_0 : i32, i32
  }
  func.func @transform_6(%arg0: i32) -> (i32, i32) {
    %c0_i32 = arith.constant 0 : i32
    %c0_i32_0 = arith.constant 0 : i32
    %c0_i32_1 = arith.constant 0 : i32
    return %c0_i32, %c0_i32_0 : i32, i32
  }
  func.func @transform_7(%arg0: i32) -> (i32, i32) {
    %c0_i32 = arith.constant 0 : i32
    %c0_i32_0 = arith.constant 0 : i32
    %c0_i32_1 = arith.constant 0 : i32
    return %c0_i32, %c0_i32_0 : i32, i32
  }
  func.func @transform_8(%arg0: i32) -> (i32, i32) {
    %c0_i32 = arith.constant 0 : i32
    %c0_i32_0 = arith.constant 0 : i32
    %c0_i32_1 = arith.constant 0 : i32
    return %c0_i32, %c0_i32_0 : i32, i32
  }
  func.func @transform_9(%arg0: i32) -> (i32, i32) {
    %c0_i32 = arith.constant 0 : i32
    %c0_i32_0 = arith.constant 0 : i32
    %c0_i32_1 = arith.constant 0 : i32
    return %c0_i32, %c0_i32_0 : i32, i32
  }
  func.func @transform_10(%arg0: i32) -> (i32, i32) {
    %c0_i32 = arith.constant 0 : i32
    %c0_i32_0 = arith.constant 0 : i32
    %c0_i32_1 = arith.constant 0 : i32
    return %c0_i32, %c0_i32_0 : i32, i32
  }
  func.func @transform_11(%arg0: i32) -> (i32, i32) {
    %c0_i32 = arith.constant 0 : i32
    %c0_i32_0 = arith.constant 0 : i32
    return %arg0, %c0_i32 : i32, i32
  }
}

</mosaic_0001>

<bundles_post_ra>
// kernel: enhanced_skin_lesion_forward.1
= control target key start
LH: loop header
LB: loop body
LE: loop exit
PB: predicated region body
PF: predicated region fallthrough
CT: control target
= control target key end

     0   :  { %16 = vsyncpa [#allocation3], 0  ;;  %s5306_s17 = smov 0   ;;  %s6846_s0 = inlined_call_operand.vmem [shape: bf16[16,3072], index: 0, kind: input, shape index: {}]   ;;  %s6847_s1 = inlined_call_operand.vmem [shape: f32[16,8], index: 1, kind: input, shape index: {}]   ;;  %s6848_s2 = inlined_call_operand.vmem [shape: f32[3,1280], index: 2, kind: input, shape index: {}]   ;;  %s6849_s3 = inlined_call_operand.vmem [shape: f32[1,1280], index: 3, kind: input, shape index: {}]   ;;  %s6850_s4 = inlined_call_operand.vmem [shape: bf16[1280,512], index: 4, kind: input, shape index: {}]   ;;  %s6851_s5 = inlined_call_operand.vmem [shape: f32[8,512], index: 5, kind: input, shape index: {}]   ;;  %s6852_s6 = inlined_call_operand.vmem [shape: f32[1,512], index: 6, kind: input, shape index: {}]   ;;  %s6853_s7 = inlined_call_operand.hbm [shape: bf16[512,256], index: 7, kind: input, shape index: {}]   ;;  %s6854_s8 = inlined_call_operand.vmem [shape: f32[1,256], index: 8, kind: input, shape index: {}]   ;;  %s6855_s9 = inlined_call_operand.vmem [shape: bf16[256,128], index: 9, kind: input, shape index: {}]   ;;  %s6856_s10 = inlined_call_operand.vmem [shape: f32[1,128], index: 10, kind: input, shape index: {}]   ;;  %s6857_s11 = inlined_call_operand.vmem [shape: f32[16,128], index: 11, kind: output, shape index: {}]  }
   0x1 LB: > { %s5312_s18 = sadd.s32 4294967295, %s5233_s17   ;;  %p4114_p0 = scmp.ge.s32.totalorder %s5233_s17, 1  ;;  %s5233_s17 = sphi %s5306_s17, %s22_s17  }
   0x2   : > { %p294_p1 = scmp.lt.s32.totalorder %s5233_s17, 3  ;;  %s5235_s19 = smov [#allocation2]  }
   0x3   : > { %s321_s20 = sshll.u32 %s5235_s19, 4  ;;  %p6858_p3 = scmp.eq.s32.totalorder %s5312_s18, 0  ;;  %s322_s20 = int_to_ptr.vmem [resolvable:$true] %s321_s20 }
   0x4   : > { %p5316_p2 = pnand %p4114_p0, %p294_p1  ;;  %s5195_s25 = scalar_lea.hbm %s6853_s7, 8192 }
   0x5   : > { %p5196_p6 = scmp.ne.s32.totalorder %s6853_s7, %s5195_s25  ;;  %p5202_p10 = scmp.lt.u32.totalorder %s5195_s25, %s6853_s7 }
   0x6   : > { %s6861_s21 = scalar_select %p5316_p2, 1, 0 }
   0x7   : > { %p4564_p4 = pneg %p5316_p2 }
   0x9   : > { %p5325_p5 = pnand %p6858_p3, %p4564_p4 }
   0xb   : > { %p5197_p7 = pneg %p5325_p5 }
   0xd   : > { %p5198_p8 = pnand %p5197_p7, %p5196_p6 }
   0xf   : > { %p5199_p9 = pneg %p5198_p8 }
  0x11   : > { %p5204_p11 = pnand %p5202_p10, %p5199_p9 }
  0x13   : > { %5207 = shalt.err (!%p5204_p11)
}
  0x14   : > { %s5208_s30 = scalar_lea.vmem %s322_s20, 8192  ;;  %p5216_p1 = scmp.lt.s32.totalorder %s322_s20, %s322_s20 }
  0x15   : > { %p5209_p12 = scmp.ne.s32.totalorder %s322_s20, %s5208_s30  ;;  %p5217_p4 = scmp.lt.s32.totalorder %s5208_s30, %s5208_s30 }
  0x17   : > { %p5211_p13 = pnand %p5209_p12, %p5197_p7  ;;  %p5218_p3 = por %p5217_p4, %p5216_p1 }
  0x19   : > { %p5212_p0 = pneg %p5211_p13 }
  0x1b   : > { %p5219_p2 = pnand %p5218_p3, %p5212_p0 }
  0x1d   : > { %5222 = shalt.err (!%p5219_p2)
}
  0x1e   : > { %s5236_s12 = smov 128   ;;  %s5237_s13 = smov 8  }
  0x1f   : > { %4567 = dma.hbm_to_vmem [thread:$0]  (!%p5325_p5), %s6853_s7, 8192, %s322_s20, [#allocation3], %s5236_s12, %s5236_s12, %s5237_s13  }
  0x20   : > { %p6863_p6 = scmp.ne.s32.totalorder %s6861_s21, 0 }
  0x21   : > { %p6864_p8 = scmp.eq.s32.totalorder (!%p6863_p6), %s5312_s18, 0 }
  0x22   : > { %361 = sbr.rel (%p6863_p6) target bundleno = 1243 (0x4db), region = 64 }
  0x29   : > { %5228 = dma.done.wait (%p6864_p8), [#allocation3], 8192   ;;  %p6865_p7 = pmov %p6864_p8 }
  0x2a   : > { %p404_p2 = scmp.lt.s32.totalorder %s5312_s18, 1  ;;  %v4598_v18 = vld [vmem:[%s6850_s4 + $0x4] ss:$16 sps:$4 sm:$0xff]   ;;  %v4602_v28 = vld [vmem:[%s6850_s4] ss:$16 sps:$4 sm:$0xff]  }
  0x2b   : > { %5230 = vsyncadd (%p6865_p7), [#allocation3], 4294959104  ;;  %v4600_v24 = vld [vmem:[%s6850_s4 + $0x404] ss:$16 sps:$4 sm:$0xff]   ;;  %2725 = vmatprep.subr.bf16.mxu1 %v4598_v18  ;;  %v4603_v29 = vld [vmem:[%s6850_s4 + $0x400] ss:$16 sps:$4 sm:$0xff]  }
  0x2c   : > { %s6876_s18 = smov (!%p404_p2, %s5312_s18), 1  ;;  %2807 = vmatprep.subr.bf16.mxu0 %v4600_v24  ;;  %v4604_v34 = vld [vmem:[%s6850_s4 + $0x24] ss:$16 sps:$4 sm:$0xff]   ;;  %2726 = vmatpush1.bf16.msra.mxu1 %v4602_v28  ;;  %v4608_v38 = vld [vmem:[%s6850_s4 + $0x20] ss:$16 sps:$4 sm:$0xff]  }
  0x2d   : > { %s4559_s16 = smul.u32 96, %s6876_s18  ;;  %2808 = vmatpush1.bf16.msra.mxu0 %v4603_v29  ;;  %v4606_v37 = vld [vmem:[%s6850_s4 + $0x424] ss:$16 sps:$4 sm:$0xff]   ;;  %2727 = vmatprep.subr.bf16.mxu1 %v4604_v34  ;;  %v4609_v43 = vld [vmem:[%s6850_s4 + $0x420] ss:$16 sps:$4 sm:$0xff]  }
  0x2e   : > { %2809 = vmatprep.subr.bf16.mxu0 %v4606_v37  ;;  %v4610_v46 = vld [vmem:[%s6850_s4 + $0x44] ss:$16 sps:$4 sm:$0xff]   ;;  %v4614_v53 = vld [vmem:[%s6850_s4 + $0x40] ss:$16 sps:$4 sm:$0xff]  }
  0x2f   : > { %s5359_s20 = scalar_lea.vmem %s6846_s0, %s4559_s16  ;;  %v4612_v52 = vld [vmem:[%s6850_s4 + $0x444] ss:$16 sps:$4 sm:$0xff]   ;;  %v4615_v56 = vld [vmem:[%s6850_s4 + $0x440] ss:$16 sps:$4 sm:$0xff]   ;;  %s4120_s16 = sshll.u32 %s6876_s18, 3 }
  0x30   : > { %v420_v0 = vld [vmem:[%s5359_s20] sm:$0xff]  ;;  %v421_v1 = vld [vmem:[%s5359_s20 + $0x8] sm:$0xff]  ;;  %v422_v2 = vld [vmem:[%s5359_s20 + $0x10] sm:$0xff]  ;;  %2728 = vmatpush1.bf16.msra.mxu1 %v4608_v38  ;;  %s5577_s21 = scalar_lea.vmem %s6847_s1, %s4120_s16  ;;  %s416_s30 = scalar_lea.vmem %s6857_s11, %s4120_s16 }
  0x31   : > { %v424_v3 = vunpack.c.l.bf16 %v420_v0  ;;  %v425_v4 = vunpack.c.h.bf16 %v420_v0  ;;  %v426_v5 = vunpack.c.l.bf16 %v421_v1  ;;  %v569_v6 = vld [vmem:[%s5359_s20 + $0x20] sm:$0xff]  ;;  %v570_v7 = vld [vmem:[%s5359_s20 + $0x28] sm:$0xff]  ;;  %v427_v8 = vunpack.c.h.bf16 %v421_v1  ;;  %v571_v11 = vld [vmem:[%s5359_s20 + $0x30] sm:$0xff]  ;;  %2810 = vmatpush1.bf16.msra.mxu0 %v4609_v43  ;;  %2729 = vmatprep.subr.bf16.mxu1 %v4610_v46 }
  0x32   : > { %v667_v9 = vld [vmem:[%s5359_s20 + $0x40] sm:$0xff]  ;;  %v573_v12 = vunpack.c.l.bf16 %v569_v6  ;;  %v574_v13 = vunpack.c.h.bf16 %v569_v6  ;;  %v575_v14 = vunpack.c.l.bf16 %v570_v7  ;;  %v668_v15 = vld [vmem:[%s5359_s20 + $0x48] sm:$0xff]  ;;  %v423_v16 = vld [vmem:[%s5359_s20 + $0x18] sm:$0xff]  ;;  %v428_v17 = vunpack.c.l.bf16 %v422_v2  ;;  %2811 = vmatprep.subr.bf16.mxu0 %v4612_v52 }
  0x33   : > { %v432_v10 = vadd.f32 %v425_v4, %v424_v3  ;;  %v576_v20 = vunpack.c.h.bf16 %v570_v7  ;;  %v669_v22 = vld [vmem:[%s5359_s20 + $0x50] sm:$0xff]  ;;  %v671_v23 = vunpack.c.l.bf16 %v667_v9  ;;  %v572_v25 = vld [vmem:[%s5359_s20 + $0x38] sm:$0xff]  ;;  %v672_v26 = vunpack.c.h.bf16 %v667_v9 }
  0x34   : > { %v581_v21 = vadd.f32 %v574_v13, %v573_v12  ;;  %v673_v27 = vunpack.c.l.bf16 %v668_v15  ;;  %v429_v30 = vunpack.c.h.bf16 %v422_v2  ;;  %v577_v32 = vunpack.c.l.bf16 %v571_v11  ;;  %v670_v51 = vld [vmem:[%s5359_s20 + $0x58] sm:$0xff]  ;;  %v4616_v60 = vld [vmem:[%s6850_s4 + $0x64] ss:$16 sps:$4 sm:$0xff]   ;;  %2730 = vmatpush1.bf16.msra.mxu1 %v4614_v53  ;;  %v4620_v4 = vld [vmem:[%s6850_s4 + $0x60] ss:$16 sps:$4 sm:$0xff]  }
  0x35   : > { %v433_v19 = vadd.f32 %v432_v10, %v426_v5  ;;  %v674_v35 = vunpack.c.h.bf16 %v668_v15  ;;  %v679_v36 = vadd.f32 %v672_v26, %v671_v23  ;;  %v430_v39 = vunpack.c.l.bf16 %v423_v16  ;;  %v4618_v63 = vld [vmem:[%s6850_s4 + $0x464] ss:$16 sps:$4 sm:$0xff]   ;;  %2812 = vmatpush1.bf16.msra.mxu0 %v4615_v56  ;;  %v4621_v5 = vld [vmem:[%s6850_s4 + $0x460] ss:$16 sps:$4 sm:$0xff]   ;;  %2731 = vmatprep.subr.bf16.mxu1 %v4616_v60 }
  0x36   : > { %v582_v33 = vadd.f32 %v581_v21, %v575_v14  ;;  %v578_v41 = vunpack.c.h.bf16 %v571_v11  ;;  %v675_v44 = vunpack.c.l.bf16 %v669_v22  ;;  %v431_v47 = vunpack.c.h.bf16 %v423_v16  ;;  %v4622_v7 = vld [vmem:[%s6850_s4 + $0x84] ss:$16 sps:$4 sm:$0xff]   ;;  %2813 = vmatprep.subr.bf16.mxu0 %v4618_v63  ;;  %v4626_v10 = vld [vmem:[%s6850_s4 + $0x80] ss:$16 sps:$4 sm:$0xff]  }
  0x37   : > { %v434_v31 = vadd.f32 %v433_v19, %v427_v8  ;;  %v680_v45 = vadd.f32 %v679_v36, %v673_v27  ;;  %v579_v49 = vunpack.c.l.bf16 %v572_v25  ;;  %v676_v54 = vunpack.c.h.bf16 %v669_v22  ;;  %v4624_v9 = vld [vmem:[%s6850_s4 + $0x484] ss:$16 sps:$4 sm:$0xff]   ;;  %v4627_v11 = vld [vmem:[%s6850_s4 + $0x480] ss:$16 sps:$4 sm:$0xff]  }
  0x38   : > { %v583_v42 = vadd.f32 %v582_v33, %v576_v20  ;;  %v580_v58 = vunpack.c.h.bf16 %v572_v25  ;;  %v677_v61 = vunpack.c.l.bf16 %v670_v51  ;;  %v678_v2 = vunpack.c.h.bf16 %v670_v51  ;;  %2732 = vmatpush1.bf16.msra.mxu1 %v4620_v4  ;;  %v4628_v13 = vld [vmem:[%s6850_s4 + $0xa4] ss:$16 sps:$4 sm:$0xff]   ;;  %v4632_v15 = vld [vmem:[%s6850_s4 + $0xa0] ss:$16 sps:$4 sm:$0xff]  }
  0x39   : > { %v435_v40 = vadd.f32 %v434_v31, %v428_v17  ;;  %v681_v55 = vadd.f32 %v680_v45, %v674_v35  ;;  %2814 = vmatpush1.bf16.msra.mxu0 %v4621_v5  ;;  %2733 = vmatprep.subr.bf16.mxu1 %v4622_v7  ;;  %v4630_v14 = vld [vmem:[%s6850_s4 + $0x4a4] ss:$16 sps:$4 sm:$0xff]   ;;  %v4633_v16 = vld [vmem:[%s6850_s4 + $0x4a0] ss:$16 sps:$4 sm:$0xff]  }
  0x3a   : > { %v584_v50 = vadd.f32 %v583_v42, %v577_v32  ;;  %2815 = vmatprep.subr.bf16.mxu0 %v4624_v9  ;;  %v4634_v17 = vld [vmem:[%s6850_s4 + $0xc4] ss:$16 sps:$4 sm:$0xff]   ;;  %v4638_v19 = vld [vmem:[%s6850_s4 + $0xc0] ss:$16 sps:$4 sm:$0xff]  }
  0x3b   : > { %v436_v48 = vadd.f32 %v435_v40, %v429_v30  ;;  %v682_v62 = vadd.f32 %v681_v55, %v675_v44  ;;  %v4636_v18 = vld [vmem:[%s6850_s4 + $0x4c4] ss:$16 sps:$4 sm:$0xff]   ;;  %v4639_v20 = vld [vmem:[%s6850_s4 + $0x4c0] ss:$16 sps:$4 sm:$0xff]  }
  0x3c   : > { %v585_v59 = vadd.f32 %v584_v50, %v578_v41  ;;  %2734 = vmatpush1.bf16.msra.mxu1 %v4626_v10  ;;  %v4640_v21 = vld [vmem:[%s6850_s4 + $0xe4] ss:$16 sps:$4 sm:$0xff]   ;;  %v4644_v23 = vld [vmem:[%s6850_s4 + $0xe0] ss:$16 sps:$4 sm:$0xff]  }
  0x3d   : > { %v437_v57 = vadd.f32 %v436_v48, %v430_v39  ;;  %v683_v3 = vadd.f32 %v682_v62, %v676_v54  ;;  %2816 = vmatpush1.bf16.msra.mxu0 %v4627_v11  ;;  %2735 = vmatprep.subr.bf16.mxu1 %v4628_v13  ;;  %v4642_v22 = vld [vmem:[%s6850_s4 + $0x4e4] ss:$16 sps:$4 sm:$0xff]   ;;  %v4645_v24 = vld [vmem:[%s6850_s4 + $0x4e0] ss:$16 sps:$4 sm:$0xff]  }
  0x3e   : > { %v586_v1 = vadd.f32 %v585_v59, %v579_v49  ;;  %2817 = vmatprep.subr.bf16.mxu0 %v4630_v14  ;;  %v4646_v25 = vld [vmem:[%s6850_s4 + $0x104] ss:$16 sps:$4 sm:$0xff]   ;;  %v4650_v27 = vld [vmem:[%s6850_s4 + $0x100] ss:$16 sps:$4 sm:$0xff]   ;;  %v5238_v59 = vmov 0  }
  0x3f   : > { %v438_v0 = vadd.f32 %v437_v57, %v431_v47  ;;  %v684_v8 = vadd.f32 %v683_v3, %v677_v61  ;;  %v4648_v26 = vld [vmem:[%s6850_s4 + $0x504] ss:$16 sps:$4 sm:$0xff]   ;;  %v4651_v28 = vld [vmem:[%s6850_s4 + $0x500] ss:$16 sps:$4 sm:$0xff]   ;;  %4589 = vset.pattern.permute.xlu1 %v5238_v59  ;;  %v6860_v61 = vlaneseq }
  0x40   : > { %v587_v6 = vadd.f32 %v586_v1, %v580_v58  ;;  %2736 = vmatpush1.bf16.msra.mxu1 %v4632_v15  ;;  %v4652_v29 = vld [vmem:[%s6850_s4 + $0x124] ss:$16 sps:$4 sm:$0xff]   ;;  %v4656_v31 = vld [vmem:[%s6850_s4 + $0x120] ss:$16 sps:$4 sm:$0xff]  }
  0x41   : > { %439 = vadd.xlane.f32.xlu0 %v438_v0  ;;  %v685_v12 = vadd.f32 %v684_v8, %v678_v2  ;;  %2818 = vmatpush1.bf16.msra.mxu0 %v4633_v16  ;;  %v4654_v30 = vld [vmem:[%s6850_s4 + $0x524] ss:$16 sps:$4 sm:$0xff]   ;;  %v4657_v32 = vld [vmem:[%s6850_s4 + $0x520] ss:$16 sps:$4 sm:$0xff]   ;;  %v448_v62 = vshrl.u32 %v6860_v61, 7 }
  0x42   : > { %2737 = vmatprep.subr.bf16.mxu1 %v4634_v17  ;;  %2819 = vmatprep.subr.bf16.mxu0 %v4636_v18  ;;  %v4658_v33 = vld [vmem:[%s6850_s4 + $0x144] ss:$16 sps:$4 sm:$0xff]   ;;  %v4662_v35 = vld [vmem:[%s6850_s4 + $0x140] ss:$16 sps:$4 sm:$0xff]   ;;  %v5633_v16 = vld [vmem:[%s6849_s3 + $0x8] sm:$0x3] }
  0x43   : > { %686 = vadd.xlane.f32.xlu1 %v685_v12  ;;  %v4660_v34 = vld [vmem:[%s6850_s4 + $0x544] ss:$16 sps:$4 sm:$0xff]   ;;  %v4663_v36 = vld [vmem:[%s6850_s4 + $0x540] ss:$16 sps:$4 sm:$0xff]   ;;  %v5589_v0 = vsub.s32 1, %v448_v62  ;;  %v5601_v3 = vsub.s32 5, %v448_v62 }
  0x44   : > { %2738 = vmatpush1.bf16.msra.mxu1 %v4638_v19  ;;  %v4664_v37 = vld [vmem:[%s6850_s4 + $0x164] ss:$16 sps:$4 sm:$0xff]   ;;  %v4668_v39 = vld [vmem:[%s6850_s4 + $0x160] ss:$16 sps:$4 sm:$0xff]   ;;  %v5603_v4 = vsub.s32 0, %v448_v62  ;;  %v5612_v7 = vsub.s32 3, %v448_v62 }
  0x45   : > { %588 = vadd.xlane.f32.xlu0 %v587_v6  ;;  %2820 = vmatpush1.bf16.msra.mxu0 %v4639_v20  ;;  %v4666_v38 = vld [vmem:[%s6850_s4 + $0x564] ss:$16 sps:$4 sm:$0xff]   ;;  %v4669_v40 = vld [vmem:[%s6850_s4 + $0x560] ss:$16 sps:$4 sm:$0xff]   ;;  %v5610_v6 = vsub.s32 4, %v448_v62  ;;  %v5616_v9 = vsub.s32 2, %v448_v62 }
  0x46   : > { %2739 = vmatprep.subr.bf16.mxu1 %v4640_v21  ;;  %2821 = vmatprep.subr.bf16.mxu0 %v4642_v22  ;;  %v4670_v41 = vld [vmem:[%s6850_s4 + $0x184] ss:$16 sps:$4 sm:$0xff]   ;;  %v4674_v43 = vld [vmem:[%s6850_s4 + $0x180] ss:$16 sps:$4 sm:$0xff]   ;;  %v5618_v10 = vsub.s32 7, %v448_v62  ;;  %v5620_v11 = vsub.s32 6, %v448_v62 }
  0x47   : > { %v4672_v42 = vld [vmem:[%s6850_s4 + $0x584] ss:$16 sps:$4 sm:$0xff]   ;;  %v4675_v44 = vld [vmem:[%s6850_s4 + $0x580] ss:$16 sps:$4 sm:$0xff]  }
  0x48   : > { %2740 = vmatpush1.bf16.msra.mxu1 %v4644_v23  ;;  %v4676_v45 = vld [vmem:[%s6850_s4 + $0x1a4] ss:$16 sps:$4 sm:$0xff]   ;;  %v4680_v47 = vld [vmem:[%s6850_s4 + $0x1a0] ss:$16 sps:$4 sm:$0xff]  }
  0x49   : > { %2822 = vmatpush1.bf16.msra.mxu0 %v4645_v24  ;;  %2741 = vmatprep.subr.bf16.mxu1 %v4646_v25  ;;  %v4678_v46 = vld [vmem:[%s6850_s4 + $0x5a4] ss:$16 sps:$4 sm:$0xff]   ;;  %v4681_v48 = vld [vmem:[%s6850_s4 + $0x5a0] ss:$16 sps:$4 sm:$0xff]  }
  0x4a   : > { %2823 = vmatprep.subr.bf16.mxu0 %v4648_v26  ;;  %v4682_v49 = vld [vmem:[%s6850_s4 + $0x1c4] ss:$16 sps:$4 sm:$0xff]   ;;  %v4686_v51 = vld [vmem:[%s6850_s4 + $0x1c0] ss:$16 sps:$4 sm:$0xff]  }
  0x4b   : > { %v4684_v50 = vld [vmem:[%s6850_s4 + $0x5c4] ss:$16 sps:$4 sm:$0xff]   ;;  %v4687_v52 = vld [vmem:[%s6850_s4 + $0x5c0] ss:$16 sps:$4 sm:$0xff]  }
  0x4c   : > { %2742 = vmatpush1.bf16.msra.mxu1 %v4650_v27  ;;  %v4688_v53 = vld [vmem:[%s6850_s4 + $0x1e4] ss:$16 sps:$4 sm:$0xff]   ;;  %v4692_v55 = vld [vmem:[%s6850_s4 + $0x1e0] ss:$16 sps:$4 sm:$0xff]  }
  0x4d   : > { %2824 = vmatpush1.bf16.msra.mxu0 %v4651_v28  ;;  %2743 = vmatprep.subr.bf16.mxu1 %v4652_v29  ;;  %v4690_v54 = vld [vmem:[%s6850_s4 + $0x5e4] ss:$16 sps:$4 sm:$0xff]   ;;  %v4693_v56 = vld [vmem:[%s6850_s4 + $0x5e0] ss:$16 sps:$4 sm:$0xff]  }
  0x4e   : > { %2825 = vmatprep.subr.bf16.mxu0 %v4654_v30  ;;  %v4696_v57 = vld [vmem:[%s6850_s4 + $0x204] ss:$16 sps:$4 sm:$0xff]  }
  0x4f   : > { %v4699_v58 = vld [vmem:[%s6850_s4 + $0x804] ss:$16 sps:$4 sm:$0xff]  }
  0x50   : > { %2744 = vmatpush1.bf16.msra.mxu1 %v4656_v31  ;;  %v5580_v60 = vld [vmem:[%s5577_s21] sm:$0xff] }
  0x51   : > { %2826 = vmatpush1.bf16.msra.mxu0 %v4657_v32  ;;  %2745 = vmatprep.subr.bf16.mxu1 %v4658_v33  ;;  %v5587_v63 = vld [vmem:[%s6849_s3] sm:$0xff] }
  0x52   : > { %2827 = vmatprep.subr.bf16.mxu0 %v4660_v34  ;;  %v5594_v1 = vld [vmem:[%s6848_s2] ss:$4 sm:$0xff]  ;;  %v5599_v2 = vld [vmem:[%s6848_s2 + $0x1] ss:$4 sm:$0xff]  ;;  %v5608_v5 = vld [vmem:[%s6848_s2 + $0x2] ss:$4 sm:$0xff]  ;;  %v516_v8 = vrot.slane %v5587_v63, %v5589_v0  ;;  %v532_v13 = vrot.slane %v5587_v63, %v5601_v3  ;;  %v512_v14 = vrot.slane %v5587_v63, %v5603_v4  ;;  %v528_v15 = vrot.slane %v5587_v63, %v5610_v6 }
  0x53   : > { %v454_v12 = vrot.slane %v5594_v1, %v5589_v0  ;;  %v604_v17 = vrot.slane %v5599_v2, %v5589_v0  ;;  %v702_v18 = vrot.slane %v5608_v5, %v5589_v0  ;;  %v470_v19 = vrot.slane %v5594_v1, %v5601_v3  ;;  %v4122_v21 = vld [vmem:[%s6848_s2 + $0x20] ss:$4 sm:$0x3]  ;;  %v5649_v22 = vld [vmem:[%s6848_s2 + $0x21] ss:$4 sm:$0x3] }
  0x54   : > { %2746 = vmatpush1.bf16.msra.mxu1 %v4662_v35  ;;  %1102 = vperm.xlu1 %4589, %v5580_v60   ;;  %v620_v20 = vrot.slane %v5599_v2, %v5601_v3  ;;  %v718_v23 = vrot.slane %v5608_v5, %v5601_v3  ;;  %v450_v24 = vrot.slane %v5594_v1, %v5603_v4  ;;  %v5662_v27 = vld [vmem:[%s6848_s2 + $0x22] ss:$4 sm:$0x3] }
  0x55   : > { %2828 = vmatpush1.bf16.msra.mxu0 %v4663_v36  ;;  %2747 = vmatprep.subr.bf16.mxu1 %v4664_v37  ;;  %v600_v25 = vrot.slane %v5599_v2, %v5603_v4  ;;  %v698_v26 = vrot.slane %v5608_v5, %v5603_v4  ;;  %v466_v28 = vrot.slane %v5594_v1, %v5610_v6 }
  0x56   : > { %2829 = vmatprep.subr.bf16.mxu0 %v4666_v38  ;;  %v616_v29 = vrot.slane %v5599_v2, %v5610_v6  ;;  %v714_v30 = vrot.slane %v5608_v5, %v5610_v6  ;;  %v462_v31 = vrot.slane %v5594_v1, %v5612_v7  ;;  %v524_v32 = vrot.slane %v5587_v63, %v5612_v7 }
  0x57   : > { %v612_v33 = vrot.slane %v5599_v2, %v5612_v7  ;;  %v710_v34 = vrot.slane %v5608_v5, %v5612_v7  ;;  %v482_v35 = vrot.slane %v4122_v21, %v5603_v4  ;;  %v486_v36 = vrot.slane %v4122_v21, %v5589_v0 }
  0x58   : > { %2748 = vmatpush1.bf16.msra.mxu1 %v4668_v39  ;;  %v544_v37 = vrot.slane %v5633_v16, %v5603_v4  ;;  %v548_v38 = vrot.slane %v5633_v16, %v5589_v0  ;;  %v632_v39 = vrot.slane %v5649_v22, %v5603_v4  ;;  %v4700_v16 = vld [vmem:[%s6850_s4 + $0x220] ss:$16 sps:$4 sm:$0xff]  }
  0x59   : > { %2830 = vmatpush1.bf16.msra.mxu0 %v4669_v40  ;;  %2749 = vmatprep.subr.bf16.mxu1 %v4670_v41  ;;  %v636_v40 = vrot.slane %v5649_v22, %v5589_v0  ;;  %v730_v41 = vrot.slane %v5662_v27, %v5603_v4  ;;  %v4703_v22 = vld [vmem:[%s6850_s4 + $0x820] ss:$16 sps:$4 sm:$0xff]  }
  0x5a   : > { %2831 = vmatprep.subr.bf16.mxu0 %v4672_v42  ;;  %v734_v42 = vrot.slane %v5662_v27, %v5589_v0  ;;  %v4708_v27 = vld [vmem:[%s6850_s4 + $0x244] ss:$16 sps:$4 sm:$0xff]  }
  0x5c   : > { %2750 = vmatpush1.bf16.msra.mxu1 %v4674_v43  ;;  %v458_v43 = vrot.slane %v5594_v1, %v5616_v9 }
  0x5d   : > { %2832 = vmatpush1.bf16.msra.mxu0 %v4675_v44  ;;  %2751 = vmatprep.subr.bf16.mxu1 %v4676_v45  ;;  %v520_v45 = vrot.slane %v5587_v63, %v5616_v9 }
  0x5e   : > { %2833 = vmatprep.subr.bf16.mxu0 %v4678_v46  ;;  %v608_v46 = vrot.slane %v5599_v2, %v5616_v9 }
  0x60   : > { %2752 = vmatpush1.bf16.msra.mxu1 %v4680_v47  ;;  %v706_v47 = vrot.slane %v5608_v5, %v5616_v9 }
  0x61   : > { %2834 = vmatpush1.bf16.msra.mxu0 %v4681_v48  ;;  %2753 = vmatprep.subr.bf16.mxu1 %v4682_v49 }
  0x62   : > { %2835 = vmatprep.subr.bf16.mxu0 %v4684_v50 }
  0x64   : > { %2754 = vmatpush1.bf16.msra.mxu1 %v4686_v51 }
  0x65   : > { %2836 = vmatpush1.bf16.msra.mxu0 %v4687_v52  ;;  %2755 = vmatprep.subr.bf16.mxu1 %v4688_v53 }
  0x66   : > { %2837 = vmatprep.subr.bf16.mxu0 %v4690_v54 }
  0x68   : > { %2756 = vmatpush1.bf16.msra.mxu1 %v4692_v55 }
  0x69   : > { %2838 = vmatpush1.bf16.msra.mxu0 %v4693_v56  ;;  %2766 = vmatprep.subr.bf16.mxu1 %v4696_v57 }
  0x6a   : > { %2889 = vmatprep.subr.bf16.mxu0 %v4699_v58 }
  0xce   : > { %v440_v44 = vpop.xlane.xlu0 %439 }
  0xcf   : > { %v5702_v49 = vmul.f32 0.0009765625, %v440_v44 }
  0xd0   : > { %v687_v56 = vpop.xlane.xlu1 %686 }
  0xd1   : > { %v498_v57 = vmul.f32 %v454_v12, %v5702_v49  ;;  %v502_v58 = vmul.f32 %v470_v19, %v5702_v49  ;;  %v497_v59 = vmul.f32 %v450_v24, %v5702_v49  ;;  %v501_v62 = vmul.f32 %v466_v28, %v5702_v49 }
  0xd2   : > { %v589_v21 = vpop.xlane.xlu0 %588  ;;  %v500_v44 = vmul.f32 %v462_v31, %v5702_v49  ;;  %v506_v61 = vmul.f32 %v486_v36, %v5702_v49  ;;  %v499_v54 = vmul.f32 %v458_v43, %v5702_v49  ;;  %v505_v55 = vmul.f32 %v482_v35, %v5702_v49 }
  0xd3   : > { %v5726_v50 = vmul.f32 0.0009765625, %v589_v21  ;;  %v560_v53 = vadd.f32 %v516_v8, %v498_v57  ;;  %v564_v12 = vadd.f32 %v532_v13, %v502_v58  ;;  %v559_v52 = vadd.f32 %v512_v14, %v497_v59  ;;  %v4702_v58 = vld [vmem:[%s6850_s4 + $0x224] ss:$16 sps:$4 sm:$0xff]  }
  0xd4   : > { %v5728_v19 = vmul.f32 0.0009765625, %v687_v56  ;;  %v563_v24 = vadd.f32 %v528_v15, %v501_v62  ;;  %v562_v51 = vadd.f32 %v524_v32, %v500_v44  ;;  %v568_v28 = vadd.f32 %v548_v38, %v506_v61 }
  0xd5   : > { %v648_v48 = vmul.f32 %v604_v17, %v5726_v50  ;;  %v652_v31 = vmul.f32 %v620_v20, %v5726_v50  ;;  %v647_v36 = vmul.f32 %v600_v25, %v5726_v50  ;;  %v651_v43 = vmul.f32 %v616_v29, %v5726_v50 }
  0xd6   : > { %v746_v35 = vmul.f32 %v702_v18, %v5728_v19  ;;  %v750_v21 = vmul.f32 %v718_v23, %v5728_v19  ;;  %v745_v8 = vmul.f32 %v698_v26, %v5728_v19  ;;  %v749_v13 = vmul.f32 %v714_v30, %v5728_v19  ;;  %v4694_v18 = vld [vmem:[%s6850_s4 + $0x200] ss:$16 sps:$4 sm:$0xff]  }
  0xd7   : > { %v658_v14 = vadd.f32 %v648_v48, %v560_v53  ;;  %v662_v15 = vadd.f32 %v652_v31, %v564_v12  ;;  %v657_v32 = vadd.f32 %v647_v36, %v559_v52  ;;  %v661_v61 = vadd.f32 %v651_v43, %v563_v24  ;;  %v4697_v26 = vld [vmem:[%s6850_s4 + $0x800] ss:$16 sps:$4 sm:$0xff]  }
  0xd8   : > { %v650_v17 = vmul.f32 %v612_v33, %v5726_v50  ;;  %v748_v20 = vmul.f32 %v710_v34, %v5728_v19  ;;  %v656_v25 = vmul.f32 %v636_v40, %v5726_v50  ;;  %v754_v29 = vmul.f32 %v734_v42, %v5728_v19 }
  0xd9   : > { %v756_v38 = vadd.f32 %v746_v35, %v658_v14  ;;  %v760_v23 = vadd.f32 %v750_v21, %v662_v15  ;;  %v755_v30 = vadd.f32 %v745_v8, %v657_v32  ;;  %v759_v48 = vadd.f32 %v749_v13, %v661_v61  ;;  %v4706_v13 = vld [vmem:[%s6850_s4 + $0x240] ss:$16 sps:$4 sm:$0xff]  }
  0xda   : > { %v660_v52 = vadd.f32 %v650_v17, %v562_v51  ;;  %v666_v33 = vadd.f32 %v656_v25, %v568_v28  ;;  %v561_v53 = vadd.f32 %v520_v45, %v499_v54  ;;  %v649_v34 = vmul.f32 %v608_v46, %v5726_v50  ;;  %v4705_v51 = vld [vmem:[%s6850_s4 + $0x824] ss:$16 sps:$4 sm:$0xff]  }
  0xdb   : > { %v5749_v40 = vpack.c.bf16 %v756_v38, %v756_v38  ;;  %v5751_v42 = vpack.c.bf16 %v760_v23, %v760_v23  ;;  %v5753_v56 = vpack.c.bf16 %v755_v30, %v755_v30  ;;  %v5755_v57 = vpack.c.bf16 %v759_v48, %v759_v48  ;;  %v4723_v30 = vld [vmem:[%s6850_s4 + $0x884] ss:$16 sps:$4 sm:$0xff]   ;;  %v4718_v48 = vld [vmem:[%s6850_s4 + $0x280] ss:$16 sps:$4 sm:$0xff]  }
  0xdc   : > { %v758_v59 = vadd.f32 %v748_v20, %v660_v52  ;;  %v764_v45 = vadd.f32 %v754_v29, %v666_v33  ;;  %v659_v54 = vadd.f32 %v649_v34, %v561_v53  ;;  %v747_v46 = vmul.f32 %v706_v47, %v5728_v19  ;;  %v4721_v52 = vld [vmem:[%s6850_s4 + $0x880] ss:$16 sps:$4 sm:$0xff]   ;;  %v4726_v33 = vld [vmem:[%s6850_s4 + $0x2a4] ss:$16 sps:$4 sm:$0xff]  }
  0xdd   : > { %2757 = vmatprep.mubr.bf16.mxu1 %v5749_v40  ;;  %2839 = vmatprep.mubr.bf16.mxu0 %v5751_v42  ;;  %v567_v62 = vadd.f32 %v544_v37, %v505_v55  ;;  %v655_v44 = vmul.f32 %v632_v39, %v5726_v50  ;;  %v753_v12 = vmul.f32 %v730_v41, %v5728_v19  ;;  %v4711_v39 = vld [vmem:[%s6850_s4 + $0x844] ss:$16 sps:$4 sm:$0xff]   ;;  %v4724_v34 = vld [vmem:[%s6850_s4 + $0x2a0] ss:$16 sps:$4 sm:$0xff]  }
  0xde   : > { %2758 = vmatmul.mubr.bf16.vlgmr.msra.gmra.mrb[0].mxu1 %v5753_v56  ;;  %2840 = vmatmul.mubr.bf16.vlgmr.msra.gmra.mrb[0].mxu0 %v5755_v57  ;;  %v5782_v47 = vpack.c.bf16 %v758_v59, %v758_v59  ;;  %v5784_v24 = vpack.c.bf16 %v764_v45, %v764_v45  ;;  %v5792_v37 = vadd.f32 %v747_v46, %v659_v54  ;;  %v4729_v53 = vld [vmem:[%s6850_s4 + $0x8a4] ss:$16 sps:$4 sm:$0xff]   ;;  %v4730_v45 = vld [vmem:[%s6850_s4 + $0x2c0] ss:$16 sps:$4 sm:$0xff]  }
  0xdf   : > { %2767 = vmatpush1.bf16.msra.mxu1 %v4694_v18  ;;  %2890 = vmatpush1.bf16.msra.mxu0 %v4697_v26  ;;  %v665_v41 = vadd.f32 %v655_v44, %v567_v62  ;;  %v6866_v55 = vrot.slane %v5594_v1, %v5618_v10  ;;  %v6867_v31 = vrot.slane %v5599_v2, %v5618_v10  ;;  %v4712_v18 = vld [vmem:[%s6850_s4 + $0x260] ss:$16 sps:$4 sm:$0xff]   ;;  %v4720_v26 = vld [vmem:[%s6850_s4 + $0x284] ss:$16 sps:$4 sm:$0xff]  }
  0xe0   : > { %2798 = vmatprep.mubr.bf16.mxu1 %v5782_v47  ;;  %2921 = vmatprep.mubr.bf16.mxu0 %v5784_v24  ;;  %v6868_v43 = vrot.slane %v5608_v5, %v5618_v10  ;;  %v6869_v21 = vrot.slane %v5594_v1, %v5620_v11  ;;  %v6870_v15 = vrot.slane %v5587_v63, %v5618_v10  ;;  %v4709_v1 = vld [vmem:[%s6850_s4 + $0x840] ss:$16 sps:$4 sm:$0xff]   ;;  %v4735_v59 = vld [vmem:[%s6850_s4 + $0x8c4] ss:$16 sps:$4 sm:$0xff]  }
  0xe1   : > { %v504_v28 = vmul.f32 %v6866_v55, %v5702_v49  ;;  %v654_v36 = vmul.f32 %v6867_v31, %v5726_v50  ;;  %2768 = vmatprep.subr.bf16.mxu1 %v4702_v58  ;;  %2891 = vmatprep.subr.bf16.mxu0 %v4705_v51  ;;  %v5821_v14 = vadd.f32 %v753_v12, %v665_v41  ;;  %v4727_v58 = vld [vmem:[%s6850_s4 + $0x8a0] ss:$16 sps:$4 sm:$0xff]   ;;  %v4732_v51 = vld [vmem:[%s6850_s4 + $0x2c4] ss:$16 sps:$4 sm:$0xff]  }
  0xe2   : > { %v752_v35 = vmul.f32 %v6868_v43, %v5728_v19  ;;  %v503_v8 = vmul.f32 %v6869_v21, %v5702_v49  ;;  %v6871_v61 = vrot.slane %v5599_v2, %v5620_v11  ;;  %v6872_v49 = vrot.slane %v5587_v63, %v5620_v11  ;;  %v4714_v2 = vld [vmem:[%s6850_s4 + $0x264] ss:$16 sps:$4 sm:$0xff]   ;;  %v4733_v54 = vld [vmem:[%s6850_s4 + $0x8c0] ss:$16 sps:$4 sm:$0xff]  }
  0xe3   : > { %v566_v32 = vadd.f32 %v6870_v15, %v504_v28  ;;  %v6873_v25 = vrot.slane %v5608_v5, %v5620_v11  ;;  %2769 = vmatpush1.bf16.msra.mxu1 %v4700_v16  ;;  %2892 = vmatpush1.bf16.msra.mxu0 %v4703_v22  ;;  %v4715_v5 = vld [vmem:[%s6850_s4 + $0x860] ss:$16 sps:$4 sm:$0xff]   ;;  %v4738_v46 = vld [vmem:[%s6850_s4 + $0x2e4] ss:$16 sps:$4 sm:$0xff]  }
  0xe4   : > { %v653_v17 = vmul.f32 %v6871_v61, %v5726_v50  ;;  %v565_v20 = vadd.f32 %v6872_v49, %v503_v8  ;;  %2770 = vmatprep.subr.bf16.mxu1 %v4708_v27  ;;  %2893 = vmatprep.subr.bf16.mxu0 %v4711_v39  ;;  %v4717_v50 = vld [vmem:[%s6850_s4 + $0x864] ss:$16 sps:$4 sm:$0xff]   ;;  %v4736_v44 = vld [vmem:[%s6850_s4 + $0x2e0] ss:$16 sps:$4 sm:$0xff]  }
  0xe5   : > { %v751_v29 = vmul.f32 %v6873_v25, %v5728_v19  ;;  %v664_v38 = vadd.f32 %v654_v36, %v566_v32  ;;  %v4741_v62 = vld [vmem:[%s6850_s4 + $0x8e4] ss:$16 sps:$4 sm:$0xff]   ;;  %v4739_v12 = vld [vmem:[%s6850_s4 + $0x8e0] ss:$16 sps:$4 sm:$0xff]  }
  0xe6   : > { %v663_v63 = vadd.f32 %v653_v17, %v565_v20  ;;  %v4744_v16 = vld [vmem:[%s6850_s4 + $0x304] ss:$16 sps:$4 sm:$0xff]   ;;  %v4742_v27 = vld [vmem:[%s6850_s4 + $0x300] ss:$16 sps:$4 sm:$0xff]  }
  0xe7   : > { %v5852_v19 = vadd.f32 %v752_v35, %v664_v38  ;;  %2771 = vmatpush1.bf16.msra.mxu1 %v4706_v13  ;;  %2894 = vmatpush1.bf16.msra.mxu0 %v4709_v1  ;;  %v4747_v22 = vld [vmem:[%s6850_s4 + $0x904] ss:$16 sps:$4 sm:$0xff]   ;;  %v4745_v39 = vld [vmem:[%s6850_s4 + $0x900] ss:$16 sps:$4 sm:$0xff]  }
  0xe8   : > { %v5854_v23 = vadd.f32 %v751_v29, %v663_v63  ;;  %2772 = vmatprep.subr.bf16.mxu1 %v4714_v2  ;;  %2895 = vmatprep.subr.bf16.mxu0 %v4717_v50  ;;  %v4750_v41 = vld [vmem:[%s6850_s4 + $0x324] ss:$16 sps:$4 sm:$0xff]   ;;  %v4748_v28 = vld [vmem:[%s6850_s4 + $0x320] ss:$16 sps:$4 sm:$0xff]  }
  0xe9   : > { %v4753_v55 = vld [vmem:[%s6850_s4 + $0x924] ss:$16 sps:$4 sm:$0xff]   ;;  %v4751_v31 = vld [vmem:[%s6850_s4 + $0x920] ss:$16 sps:$4 sm:$0xff]  }
  0xea   : > { %v4756_v36 = vld [vmem:[%s6850_s4 + $0x344] ss:$16 sps:$4 sm:$0xff]   ;;  %v4754_v35 = vld [vmem:[%s6850_s4 + $0x340] ss:$16 sps:$4 sm:$0xff]  }
  0xeb   : > { %2773 = vmatpush1.bf16.msra.mxu1 %v4712_v18  ;;  %2896 = vmatpush1.bf16.msra.mxu0 %v4715_v5  ;;  %v4759_v43 = vld [vmem:[%s6850_s4 + $0x944] ss:$16 sps:$4 sm:$0xff]   ;;  %v4757_v21 = vld [vmem:[%s6850_s4 + $0x940] ss:$16 sps:$4 sm:$0xff]  }
  0xec   : > { %2774 = vmatprep.subr.bf16.mxu1 %v4720_v26  ;;  %2897 = vmatprep.subr.bf16.mxu0 %v4723_v30  ;;  %v4762_v8 = vld [vmem:[%s6850_s4 + $0x364] ss:$16 sps:$4 sm:$0xff]   ;;  %v4760_v15 = vld [vmem:[%s6850_s4 + $0x360] ss:$16 sps:$4 sm:$0xff]  }
  0xed   : > { %v4765_v13 = vld [vmem:[%s6850_s4 + $0x964] ss:$16 sps:$4 sm:$0xff]   ;;  %v4763_v32 = vld [vmem:[%s6850_s4 + $0x960] ss:$16 sps:$4 sm:$0xff]  }
  0xee   : > { %v4768_v61 = vld [vmem:[%s6850_s4 + $0x384] ss:$16 sps:$4 sm:$0xff]   ;;  %v4766_v1 = vld [vmem:[%s6850_s4 + $0x380] ss:$16 sps:$4 sm:$0xff]  }
  0xef   : > { %2775 = vmatpush1.bf16.msra.mxu1 %v4718_v48  ;;  %2898 = vmatpush1.bf16.msra.mxu0 %v4721_v52  ;;  %v4771_v17 = vld [vmem:[%s6850_s4 + $0x984] ss:$16 sps:$4 sm:$0xff]   ;;  %v4769_v49 = vld [vmem:[%s6850_s4 + $0x980] ss:$16 sps:$4 sm:$0xff]  }
  0xf0   : > { %2776 = vmatprep.subr.bf16.mxu1 %v4726_v33  ;;  %2899 = vmatprep.subr.bf16.mxu0 %v4729_v53  ;;  %v4774_v20 = vld [vmem:[%s6850_s4 + $0x3a4] ss:$16 sps:$4 sm:$0xff]   ;;  %v4772_v29 = vld [vmem:[%s6850_s4 + $0x3a0] ss:$16 sps:$4 sm:$0xff]   ;;  %v4795_v33 = vld [vmem:[%s6850_s4 + $0x20c] ss:$16 sps:$4 sm:$0xff]  }
  0xf1   : > { %v4777_v25 = vld [vmem:[%s6850_s4 + $0x9a4] ss:$16 sps:$4 sm:$0xff]   ;;  %v4775_v38 = vld [vmem:[%s6850_s4 + $0x9a0] ss:$16 sps:$4 sm:$0xff]  }
  0xf2   : > { %v4780_v2 = vld [vmem:[%s6850_s4 + $0x3c4] ss:$16 sps:$4 sm:$0xff]   ;;  %v4778_v63 = vld [vmem:[%s6850_s4 + $0x3c0] ss:$16 sps:$4 sm:$0xff]  }
  0xf3   : > { %2777 = vmatpush1.bf16.msra.mxu1 %v4724_v34  ;;  %2900 = vmatpush1.bf16.msra.mxu0 %v4727_v58  ;;  %v4783_v50 = vld [vmem:[%s6850_s4 + $0x9c4] ss:$16 sps:$4 sm:$0xff]   ;;  %v4781_v18 = vld [vmem:[%s6850_s4 + $0x9c0] ss:$16 sps:$4 sm:$0xff]   ;;  %v6011_v34 = vpack.c.bf16 %v5792_v37, %v5792_v37  ;;  %v6015_v58 = vpack.c.bf16 %v5821_v14, %v5821_v14  ;;  %v4801_v37 = vld [vmem:[%s6850_s4 + $0x22c] ss:$16 sps:$4 sm:$0xff]  }
  0xf4   : > { %2778 = vmatprep.subr.bf16.mxu1 %v4732_v51  ;;  %2901 = vmatprep.subr.bf16.mxu0 %v4735_v59  ;;  %v4786_v5 = vld [vmem:[%s6850_s4 + $0x3e4] ss:$16 sps:$4 sm:$0xff]   ;;  %v4784_v30 = vld [vmem:[%s6850_s4 + $0x3e0] ss:$16 sps:$4 sm:$0xff]   ;;  %v4793_v51 = vld [vmem:[%s6850_s4 + $0x208] ss:$16 sps:$4 sm:$0xff]   ;;  %v6022_v59 = vpack.c.bf16 %v5852_v19, %v5852_v19 }
  0xf5   : > { %v4789_v26 = vld [vmem:[%s6850_s4 + $0x9e4] ss:$16 sps:$4 sm:$0xff]   ;;  %v4787_v48 = vld [vmem:[%s6850_s4 + $0x9e0] ss:$16 sps:$4 sm:$0xff]   ;;  %v4799_v19 = vld [vmem:[%s6850_s4 + $0x228] ss:$16 sps:$4 sm:$0xff]  }
  0xf6   : > { %v4792_v52 = vld [vmem:[%s6850_s4 + $0x604] ss:$16 sps:$4 sm:$0xff]   ;;  %v4790_v53 = vld [vmem:[%s6850_s4 + $0x600] ss:$16 sps:$4 sm:$0xff]  }
  0xf7   : > { %2779 = vmatpush1.bf16.msra.mxu1 %v4730_v45  ;;  %2902 = vmatpush1.bf16.msra.mxu0 %v4733_v54  ;;  %v4798_v45 = vld [vmem:[%s6850_s4 + $0x624] ss:$16 sps:$4 sm:$0xff]   ;;  %v4796_v14 = vld [vmem:[%s6850_s4 + $0x620] ss:$16 sps:$4 sm:$0xff]  }
  0xf8   : > { %2780 = vmatprep.subr.bf16.mxu1 %v4738_v46  ;;  %2903 = vmatprep.subr.bf16.mxu0 %v4741_v62  ;;  %v4804_v54 = vld [vmem:[%s6850_s4 + $0x644] ss:$16 sps:$4 sm:$0xff]   ;;  %v4807_v46 = vld [vmem:[%s6850_s4 + $0x24c] ss:$16 sps:$4 sm:$0xff]   ;;  %v4802_v62 = vld [vmem:[%s6850_s4 + $0x640] ss:$16 sps:$4 sm:$0xff]  }
  0xfb   : > { %2781 = vmatpush1.bf16.msra.mxu1 %v4736_v44  ;;  %2904 = vmatpush1.bf16.msra.mxu0 %v4739_v12  ;;  %v4810_v44 = vld [vmem:[%s6850_s4 + $0x664] ss:$16 sps:$4 sm:$0xff]   ;;  %v4813_v12 = vld [vmem:[%s6850_s4 + $0x26c] ss:$16 sps:$4 sm:$0xff]  }
  0xfc   : > { %2782 = vmatprep.subr.bf16.mxu1 %v4744_v16  ;;  %2905 = vmatprep.subr.bf16.mxu0 %v4747_v22  ;;  %v5239_v16 = vmov 2   ;;  %v4808_v22 = vld [vmem:[%s6850_s4 + $0x660] ss:$16 sps:$4 sm:$0xff]  }
  0xfd   : > { %4591 = vset.pattern.permute.xlu1 %v5239_v16  ;;  %v4873_v16 = vld [vmem:[%s6850_s4 + $0x3ac] ss:$16 sps:$4 sm:$0xff]  }
  0xfe   : > { %3164 = vperm.xlu1 %4591, %v5580_v60  }
  0xff   : > { %2783 = vmatpush1.bf16.msra.mxu1 %v4742_v27  ;;  %2906 = vmatpush1.bf16.msra.mxu0 %v4745_v39  ;;  %v4811_v27 = vld [vmem:[%s6850_s4 + $0x268] ss:$16 sps:$4 sm:$0xff]   ;;  %v4816_v39 = vld [vmem:[%s6850_s4 + $0x684] ss:$16 sps:$4 sm:$0xff]  }
 0x100   : > { %2784 = vmatprep.subr.bf16.mxu1 %v4750_v41  ;;  %2907 = vmatprep.subr.bf16.mxu0 %v4753_v55  ;;  %v4819_v41 = vld [vmem:[%s6850_s4 + $0x28c] ss:$16 sps:$4 sm:$0xff]   ;;  %v5240_v55 = vmov 3  }
 0x102   : > { %4592 = vset.pattern.permute.xlu1 %v5240_v55  ;;  %v4874_v55 = vld [vmem:[%s6850_s4 + $0x7c0] ss:$16 sps:$4 sm:$0xff]  }
 0x103   : > { %2785 = vmatpush1.bf16.msra.mxu1 %v4748_v28  ;;  %2908 = vmatpush1.bf16.msra.mxu0 %v4751_v31  ;;  %v4814_v28 = vld [vmem:[%s6850_s4 + $0x680] ss:$16 sps:$4 sm:$0xff]   ;;  %v4817_v31 = vld [vmem:[%s6850_s4 + $0x288] ss:$16 sps:$4 sm:$0xff]  }
 0x104   : > { %2786 = vmatprep.subr.bf16.mxu1 %v4756_v36  ;;  %2909 = vmatprep.subr.bf16.mxu0 %v4759_v43  ;;  %v4822_v36 = vld [vmem:[%s6850_s4 + $0x6a4] ss:$16 sps:$4 sm:$0xff]   ;;  %v4825_v43 = vld [vmem:[%s6850_s4 + $0x2ac] ss:$16 sps:$4 sm:$0xff]  }
 0x105   : > { %3192 = vperm.xlu1 %4592, %v5580_v60   ;;  %v4820_v60 = vld [vmem:[%s6850_s4 + $0x6a0] ss:$16 sps:$4 sm:$0xff]  }
 0x107   : > { %2787 = vmatpush1.bf16.msra.mxu1 %v4754_v35  ;;  %2910 = vmatpush1.bf16.msra.mxu0 %v4757_v21  ;;  %v4823_v35 = vld [vmem:[%s6850_s4 + $0x2a8] ss:$16 sps:$4 sm:$0xff]   ;;  %v4828_v21 = vld [vmem:[%s6850_s4 + $0x6c4] ss:$16 sps:$4 sm:$0xff]  }
 0x108   : > { %2788 = vmatprep.subr.bf16.mxu1 %v4762_v8  ;;  %2911 = vmatprep.subr.bf16.mxu0 %v4765_v13  ;;  %v4831_v8 = vld [vmem:[%s6850_s4 + $0x2cc] ss:$16 sps:$4 sm:$0xff]   ;;  %v5241_v13 = vmov 4  }
 0x109   : > { %4593 = vset.pattern.permute.xlu1 %v5241_v13  ;;  %v6222_v13 = vpack.c.bf16 %v5854_v23, %v5854_v23  ;;  %v4892_v23 = vld [vmem:[%s6850_s4 + $0x28] ss:$16 sps:$4 sm:$0xff]  }
 0x10b   : > { %2789 = vmatpush1.bf16.msra.mxu1 %v4760_v15  ;;  %2912 = vmatpush1.bf16.msra.mxu0 %v4763_v32  ;;  %v5194_v15 = vld [vmem:[%s5577_s21] sm:$0xff] }
 0x10c   : > { %2790 = vmatprep.subr.bf16.mxu1 %v4768_v61  ;;  %2913 = vmatprep.subr.bf16.mxu0 %v4771_v17  ;;  %v4826_v32 = vld [vmem:[%s6850_s4 + $0x6c0] ss:$16 sps:$4 sm:$0xff]   ;;  %v5242_v61 = vmov 1   ;;  %v4829_v17 = vld [vmem:[%s6850_s4 + $0x2c8] ss:$16 sps:$4 sm:$0xff]  }
 0x10d   : > { %3220 = vperm.xlu1 %4593, %v5194_v15   ;;  %4590 = vset.pattern.permute.xlu0 %v5242_v61  ;;  %v4897_v61 = vld [vmem:[%s6850_s4 + $0x62c] ss:$16 sps:$4 sm:$0xff]  }
 0x10e   : > { %3136 = vperm.xlu0 %4590, %v5194_v15  }
 0x10f   : > { %2791 = vmatpush1.bf16.msra.mxu1 %v4766_v1  ;;  %2914 = vmatpush1.bf16.msra.mxu0 %v4769_v49  ;;  %v4834_v1 = vld [vmem:[%s6850_s4 + $0x6e4] ss:$16 sps:$4 sm:$0xff]   ;;  %v4837_v49 = vld [vmem:[%s6850_s4 + $0x2ec] ss:$16 sps:$4 sm:$0xff]  }
 0x110   : > { %2792 = vmatprep.subr.bf16.mxu1 %v4774_v20  ;;  %2915 = vmatprep.subr.bf16.mxu0 %v4777_v25  ;;  %v5243_v20 = vmov 5   ;;  %v4832_v25 = vld [vmem:[%s6850_s4 + $0x6e0] ss:$16 sps:$4 sm:$0xff]  }
 0x111   : > { %4594 = vset.pattern.permute.xlu1 %v5243_v20  ;;  %v4909_v20 = vld [vmem:[%s6850_s4 + $0x66c] ss:$16 sps:$4 sm:$0xff]  }
 0x112   : > { %3248 = vperm.xlu1 %4594, %v5194_v15  }
 0x113   : > { %2793 = vmatpush1.bf16.msra.mxu1 %v4772_v29  ;;  %2916 = vmatpush1.bf16.msra.mxu0 %v4775_v38  ;;  %v4835_v29 = vld [vmem:[%s6850_s4 + $0x2e8] ss:$16 sps:$4 sm:$0xff]   ;;  %v4840_v38 = vld [vmem:[%s6850_s4 + $0x704] ss:$16 sps:$4 sm:$0xff]  }
 0x114   : > { %2794 = vmatprep.subr.bf16.mxu1 %v4780_v2  ;;  %2917 = vmatprep.subr.bf16.mxu0 %v4783_v50  ;;  %v4843_v2 = vld [vmem:[%s6850_s4 + $0x30c] ss:$16 sps:$4 sm:$0xff]   ;;  %v4838_v50 = vld [vmem:[%s6850_s4 + $0x700] ss:$16 sps:$4 sm:$0xff]  }
 0x117   : > { %2795 = vmatpush1.bf16.msra.mxu1 %v4778_v63  ;;  %2918 = vmatpush1.bf16.msra.mxu0 %v4781_v18  ;;  %v5244_v63 = vmov 6   ;;  %v4841_v18 = vld [vmem:[%s6850_s4 + $0x308] ss:$16 sps:$4 sm:$0xff]  }
 0x118   : > { %2796 = vmatprep.subr.bf16.mxu1 %v4786_v5  ;;  %2919 = vmatprep.subr.bf16.mxu0 %v4789_v26  ;;  %v4846_v5 = vld [vmem:[%s6850_s4 + $0x724] ss:$16 sps:$4 sm:$0xff]   ;;  %v4849_v26 = vld [vmem:[%s6850_s4 + $0x32c] ss:$16 sps:$4 sm:$0xff]  }
 0x119   : > { %4595 = vset.pattern.permute.xlu1 %v5244_v63  ;;  %v4913_v63 = vld [vmem:[%s6850_s4 + $0x688] ss:$16 sps:$4 sm:$0xff]  }
 0x11a   : > { %3276 = vperm.xlu1 %4595, %v5194_v15  }
 0x11b   : > { %2797 = vmatpush1.bf16.msra.mxu1 %v4784_v30  ;;  %2920 = vmatpush1.bf16.msra.mxu0 %v4787_v48  ;;  %v5245_v30 = vmov 7   ;;  %v4844_v48 = vld [vmem:[%s6850_s4 + $0x720] ss:$16 sps:$4 sm:$0xff]  }
 0x11c   : > { %2848 = vmatprep.subr.bf16.mxu1 %v4792_v52  ;;  %2971 = vmatprep.subr.bf16.mxu0 %v4795_v33  ;;  %v4847_v52 = vld [vmem:[%s6850_s4 + $0x328] ss:$16 sps:$4 sm:$0xff]   ;;  %v4852_v33 = vld [vmem:[%s6850_s4 + $0x744] ss:$16 sps:$4 sm:$0xff]  }
 0x11d   : > { %4597 = vset.pattern.permute.xlu0 %v5245_v30 }
 0x11e   : > { %2799 = vmatmul.mubr.bf16.vlgmr.msra.gmra.mrb[4].mxu1 %v6011_v34  ;;  %2922 = vmatmul.mubr.bf16.vlgmr.msra.gmra.mrb[4].mxu0 %v6015_v58 }
 0x11f   : > { %2849 = vmatpush1.bf16.msra.mxu1 %v4790_v53  ;;  %2880 = vmatprep.mubr.bf16.mxu1 %v6022_v59  ;;  %v4855_v53 = vld [vmem:[%s6850_s4 + $0x34c] ss:$16 sps:$4 sm:$0xff]  }
 0x120   : > { %2972 = vmatpush1.bf16.msra.mxu0 %v4793_v51  ;;  %3003 = vmatprep.mubr.bf16.mxu0 %v5782_v47  ;;  %v4805_v47 = vld [vmem:[%s6850_s4 + $0x248] ss:$16 sps:$4 sm:$0xff]   ;;  %v4850_v51 = vld [vmem:[%s6850_s4 + $0x740] ss:$16 sps:$4 sm:$0xff]  }
 0x121   : > { %2850 = vmatprep.subr.bf16.mxu1 %v4798_v45  ;;  %2973 = vmatprep.subr.bf16.mxu0 %v4801_v37  ;;  %v4853_v45 = vld [vmem:[%s6850_s4 + $0x348] ss:$16 sps:$4 sm:$0xff]   ;;  %v4858_v37 = vld [vmem:[%s6850_s4 + $0x764] ss:$16 sps:$4 sm:$0xff]  }
 0x122   : > { %4596 = vset.pattern.permute.xlu1 %v5245_v30  ;;  %v4919_v30 = vld [vmem:[%s6850_s4 + $0x6a8] ss:$16 sps:$4 sm:$0xff]  }
 0x123   : > { %2851 = vmatpush1.bf16.msra.mxu1 %v4796_v14  ;;  %3304 = vperm.xlu1 %4596, %v5194_v15   ;;  %v4861_v14 = vld [vmem:[%s6850_s4 + $0x36c] ss:$16 sps:$4 sm:$0xff]   ;;  %v4889_v15 = vld [vmem:[%s6850_s4 + $0x608] ss:$16 sps:$4 sm:$0xff]  }
 0x124   : > { %2974 = vmatpush1.bf16.msra.mxu0 %v4799_v19  ;;  %2852 = vmatprep.subr.bf16.mxu1 %v4804_v54  ;;  %v4856_v19 = vld [vmem:[%s6850_s4 + $0x760] ss:$16 sps:$4 sm:$0xff]   ;;  %v4859_v54 = vld [vmem:[%s6850_s4 + $0x368] ss:$16 sps:$4 sm:$0xff]  }
 0x125   : > { %2975 = vmatprep.subr.bf16.mxu0 %v4807_v46  ;;  %v4864_v46 = vld [vmem:[%s6850_s4 + $0x784] ss:$16 sps:$4 sm:$0xff]  }
 0x127   : > { %2853 = vmatpush1.bf16.msra.mxu1 %v4802_v62  ;;  %v4867_v62 = vld [vmem:[%s6850_s4 + $0x38c] ss:$16 sps:$4 sm:$0xff]  }
 0x128   : > { %2976 = vmatpush1.bf16.msra.mxu0 %v4805_v47  ;;  %2854 = vmatprep.subr.bf16.mxu1 %v4810_v44  ;;  %v4862_v47 = vld [vmem:[%s6850_s4 + $0x780] ss:$16 sps:$4 sm:$0xff]   ;;  %v4865_v44 = vld [vmem:[%s6850_s4 + $0x388] ss:$16 sps:$4 sm:$0xff]  }
 0x129   : > { %2977 = vmatprep.subr.bf16.mxu0 %v4813_v12  ;;  %v4870_v12 = vld [vmem:[%s6850_s4 + $0x7a4] ss:$16 sps:$4 sm:$0xff]  }
 0x12b   : > { %2855 = vmatpush1.bf16.msra.mxu1 %v4808_v22  ;;  %v4868_v22 = vld [vmem:[%s6850_s4 + $0x7a0] ss:$16 sps:$4 sm:$0xff]  }
 0x12c   : > { %2978 = vmatpush1.bf16.msra.mxu0 %v4811_v27  ;;  %2856 = vmatprep.subr.bf16.mxu1 %v4816_v39  ;;  %v4871_v27 = vld [vmem:[%s6850_s4 + $0x3a8] ss:$16 sps:$4 sm:$0xff]   ;;  %v4876_v39 = vld [vmem:[%s6850_s4 + $0x7c4] ss:$16 sps:$4 sm:$0xff]  }
 0x12d   : > { %2979 = vmatprep.subr.bf16.mxu0 %v4819_v41  ;;  %v4879_v41 = vld [vmem:[%s6850_s4 + $0x3cc] ss:$16 sps:$4 sm:$0xff]  }
 0x12f   : > { %2857 = vmatpush1.bf16.msra.mxu1 %v4814_v28  ;;  %v4877_v28 = vld [vmem:[%s6850_s4 + $0x3c8] ss:$16 sps:$4 sm:$0xff]  }
 0x130   : > { %2980 = vmatpush1.bf16.msra.mxu0 %v4817_v31  ;;  %2858 = vmatprep.subr.bf16.mxu1 %v4822_v36  ;;  %v4882_v31 = vld [vmem:[%s6850_s4 + $0x7e4] ss:$16 sps:$4 sm:$0xff]   ;;  %v4885_v36 = vld [vmem:[%s6850_s4 + $0x3ec] ss:$16 sps:$4 sm:$0xff]  }
 0x131   : > { %2981 = vmatprep.subr.bf16.mxu0 %v4825_v43  ;;  %v4880_v43 = vld [vmem:[%s6850_s4 + $0x7e0] ss:$16 sps:$4 sm:$0xff]  }
 0x133   : > { %2859 = vmatpush1.bf16.msra.mxu1 %v4820_v60  ;;  %v4883_v60 = vld [vmem:[%s6850_s4 + $0x3e8] ss:$16 sps:$4 sm:$0xff]  }
 0x134   : > { %2982 = vmatpush1.bf16.msra.mxu0 %v4823_v35  ;;  %2860 = vmatprep.subr.bf16.mxu1 %v4828_v21  ;;  %v4888_v35 = vld [vmem:[%s6850_s4 + $0xc] ss:$16 sps:$4 sm:$0xff]  }
 0x135   : > { %2983 = vmatprep.subr.bf16.mxu0 %v4831_v8  ;;  %v4891_v21 = vld [vmem:[%s6850_s4 + $0x60c] ss:$16 sps:$4 sm:$0xff]   ;;  %v4886_v8 = vld [vmem:[%s6850_s4 + $0x8] ss:$16 sps:$4 sm:$0xff]  }
 0x137   : > { %2861 = vmatpush1.bf16.msra.mxu1 %v4826_v32  ;;  %v4894_v32 = vld [vmem:[%s6850_s4 + $0x2c] ss:$16 sps:$4 sm:$0xff]  }
 0x138   : > { %2984 = vmatpush1.bf16.msra.mxu0 %v4829_v17  ;;  %2862 = vmatprep.subr.bf16.mxu1 %v4834_v1  ;;  %v4895_v17 = vld [vmem:[%s6850_s4 + $0x628] ss:$16 sps:$4 sm:$0xff]   ;;  %v4900_v1 = vld [vmem:[%s6850_s4 + $0x4c] ss:$16 sps:$4 sm:$0xff]  }
 0x139   : > { %2985 = vmatprep.subr.bf16.mxu0 %v4837_v49  ;;  %v4901_v49 = vld [vmem:[%s6850_s4 + $0x648] ss:$16 sps:$4 sm:$0xff]  }
 0x13b   : > { %2863 = vmatpush1.bf16.msra.mxu1 %v4832_v25  ;;  %v4904_v25 = vld [vmem:[%s6850_s4 + $0x68] ss:$16 sps:$4 sm:$0xff]  }
 0x13c   : > { %2986 = vmatpush1.bf16.msra.mxu0 %v4835_v29  ;;  %2864 = vmatprep.subr.bf16.mxu1 %v4840_v38  ;;  %v4907_v29 = vld [vmem:[%s6850_s4 + $0x668] ss:$16 sps:$4 sm:$0xff]   ;;  %v4912_v38 = vld [vmem:[%s6850_s4 + $0x8c] ss:$16 sps:$4 sm:$0xff]  }
 0x13d   : > { %2987 = vmatprep.subr.bf16.mxu0 %v4843_v2  ;;  %v4915_v2 = vld [vmem:[%s6850_s4 + $0x68c] ss:$16 sps:$4 sm:$0xff]  }
 0x13f   : > { %2865 = vmatpush1.bf16.msra.mxu1 %v4838_v50  ;;  %v4910_v50 = vld [vmem:[%s6850_s4 + $0x88] ss:$16 sps:$4 sm:$0xff]  }
 0x140   : > { %2988 = vmatpush1.bf16.msra.mxu0 %v4841_v18  ;;  %2866 = vmatprep.subr.bf16.mxu1 %v4846_v5  ;;  %v4918_v18 = vld [vmem:[%s6850_s4 + $0xac] ss:$16 sps:$4 sm:$0xff]  }
 0x141   : > { %2989 = vmatprep.subr.bf16.mxu0 %v4849_v26  ;;  %v4921_v5 = vld [vmem:[%s6850_s4 + $0x6ac] ss:$16 sps:$4 sm:$0xff]   ;;  %v4916_v26 = vld [vmem:[%s6850_s4 + $0xa8] ss:$16 sps:$4 sm:$0xff]  }
 0x143   : > { %2867 = vmatpush1.bf16.msra.mxu1 %v4844_v48  ;;  %v4924_v48 = vld [vmem:[%s6850_s4 + $0xcc] ss:$16 sps:$4 sm:$0xff]  }
 0x144   : > { %2990 = vmatpush1.bf16.msra.mxu0 %v4847_v52  ;;  %2868 = vmatprep.subr.bf16.mxu1 %v4852_v33  ;;  %v4927_v52 = vld [vmem:[%s6850_s4 + $0x6cc] ss:$16 sps:$4 sm:$0xff]   ;;  %v4922_v33 = vld [vmem:[%s6850_s4 + $0xc8] ss:$16 sps:$4 sm:$0xff]  }
 0x145   : > { %2991 = vmatprep.subr.bf16.mxu0 %v4855_v53  ;;  %v4925_v53 = vld [vmem:[%s6850_s4 + $0x6c8] ss:$16 sps:$4 sm:$0xff]  }
 0x147   : > { %2869 = vmatpush1.bf16.msra.mxu1 %v4850_v51  ;;  %v4930_v51 = vld [vmem:[%s6850_s4 + $0xec] ss:$16 sps:$4 sm:$0xff]  }
 0x148   : > { %2992 = vmatpush1.bf16.msra.mxu0 %v4853_v45  ;;  %2870 = vmatprep.subr.bf16.mxu1 %v4858_v37  ;;  %v4933_v45 = vld [vmem:[%s6850_s4 + $0x6ec] ss:$16 sps:$4 sm:$0xff]   ;;  %v4928_v37 = vld [vmem:[%s6850_s4 + $0xe8] ss:$16 sps:$4 sm:$0xff]  }
 0x149   : > { %2993 = vmatprep.subr.bf16.mxu0 %v4861_v14  ;;  %v4931_v14 = vld [vmem:[%s6850_s4 + $0x6e8] ss:$16 sps:$4 sm:$0xff]  }
 0x14b   : > { %2871 = vmatpush1.bf16.msra.mxu1 %v4856_v19  ;;  %v4936_v19 = vld [vmem:[%s6850_s4 + $0x10c] ss:$16 sps:$4 sm:$0xff]  }
 0x14c   : > { %2994 = vmatpush1.bf16.msra.mxu0 %v4859_v54  ;;  %2872 = vmatprep.subr.bf16.mxu1 %v4864_v46  ;;  %v4939_v54 = vld [vmem:[%s6850_s4 + $0x70c] ss:$16 sps:$4 sm:$0xff]   ;;  %v4934_v46 = vld [vmem:[%s6850_s4 + $0x108] ss:$16 sps:$4 sm:$0xff]  }
 0x14d   : > { %2995 = vmatprep.subr.bf16.mxu0 %v4867_v62  ;;  %v4937_v62 = vld [vmem:[%s6850_s4 + $0x708] ss:$16 sps:$4 sm:$0xff]  }
 0x14f   : > { %2873 = vmatpush1.bf16.msra.mxu1 %v4862_v47  ;;  %v4942_v47 = vld [vmem:[%s6850_s4 + $0x12c] ss:$16 sps:$4 sm:$0xff]  }
 0x150   : > { %2996 = vmatpush1.bf16.msra.mxu0 %v4865_v44  ;;  %2874 = vmatprep.subr.bf16.mxu1 %v4870_v12  ;;  %v4945_v44 = vld [vmem:[%s6850_s4 + $0x72c] ss:$16 sps:$4 sm:$0xff]   ;;  %v4940_v12 = vld [vmem:[%s6850_s4 + $0x128] ss:$16 sps:$4 sm:$0xff]  }
 0x151   : > { %2997 = vmatprep.subr.bf16.mxu0 %v4873_v16  ;;  %v4943_v16 = vld [vmem:[%s6850_s4 + $0x728] ss:$16 sps:$4 sm:$0xff]  }
 0x153   : > { %2875 = vmatpush1.bf16.msra.mxu1 %v4868_v22  ;;  %v4948_v22 = vld [vmem:[%s6850_s4 + $0x14c] ss:$16 sps:$4 sm:$0xff]  }
 0x154   : > { %2998 = vmatpush1.bf16.msra.mxu0 %v4871_v27  ;;  %2876 = vmatprep.subr.bf16.mxu1 %v4876_v39  ;;  %v4951_v27 = vld [vmem:[%s6850_s4 + $0x74c] ss:$16 sps:$4 sm:$0xff]   ;;  %v4946_v39 = vld [vmem:[%s6850_s4 + $0x148] ss:$16 sps:$4 sm:$0xff]  }
 0x155   : > { %2999 = vmatprep.subr.bf16.mxu0 %v4879_v41  ;;  %v4949_v41 = vld [vmem:[%s6850_s4 + $0x748] ss:$16 sps:$4 sm:$0xff]  }
 0x157   : > { %2877 = vmatpush1.bf16.msra.mxu1 %v4874_v55  ;;  %v4954_v55 = vld [vmem:[%s6850_s4 + $0x16c] ss:$16 sps:$4 sm:$0xff]  }
 0x158   : > { %3000 = vmatpush1.bf16.msra.mxu0 %v4877_v28  ;;  %2878 = vmatprep.subr.bf16.mxu1 %v4882_v31  ;;  %v4957_v28 = vld [vmem:[%s6850_s4 + $0x76c] ss:$16 sps:$4 sm:$0xff]   ;;  %v4952_v31 = vld [vmem:[%s6850_s4 + $0x168] ss:$16 sps:$4 sm:$0xff]  }
 0x159   : > { %3001 = vmatprep.subr.bf16.mxu0 %v4885_v36  ;;  %v4955_v36 = vld [vmem:[%s6850_s4 + $0x768] ss:$16 sps:$4 sm:$0xff]  }
 0x15b   : > { %2879 = vmatpush1.bf16.msra.mxu1 %v4880_v43  ;;  %v4960_v43 = vld [vmem:[%s6850_s4 + $0x18c] ss:$16 sps:$4 sm:$0xff]  }
 0x15c   : > { %3002 = vmatpush1.bf16.msra.mxu0 %v4883_v60  ;;  %2930 = vmatprep.subr.bf16.mxu1 %v4888_v35  ;;  %v4963_v60 = vld [vmem:[%s6850_s4 + $0x78c] ss:$16 sps:$4 sm:$0xff]   ;;  %v4958_v35 = vld [vmem:[%s6850_s4 + $0x188] ss:$16 sps:$4 sm:$0xff]  }
 0x15d   : > { %3053 = vmatprep.subr.bf16.mxu0 %v4891_v21  ;;  %v4961_v21 = vld [vmem:[%s6850_s4 + $0x788] ss:$16 sps:$4 sm:$0xff]  }
 0x15e   : > { %2881 = vmatmul.mubr.bf16.vlgmr.msra.gmra.mrb[8].mxu1 %v6222_v13 }
 0x15f   : > { %3004 = vmatmul.mubr.bf16.vlgmr.msra.gmra.mrb[8].mxu0 %v6011_v34  ;;  %2931 = vmatpush1.bf16.msra.mxu1 %v4886_v8  ;;  %v4903_v34 = vld [vmem:[%s6850_s4 + $0x64c] ss:$16 sps:$4 sm:$0xff]  }
 0x160   : > { %2962 = vmatprep.mubr.bf16.mxu1 %v5749_v40  ;;  %3054 = vmatpush1.bf16.msra.mxu0 %v4889_v15  ;;  %v4898_v40 = vld [vmem:[%s6850_s4 + $0x48] ss:$16 sps:$4 sm:$0xff]   ;;  %v4966_v8 = vld [vmem:[%s6850_s4 + $0x1ac] ss:$16 sps:$4 sm:$0xff]  }
 0x161   : > { %3085 = vmatprep.mubr.bf16.mxu0 %v6022_v59  ;;  %2932 = vmatprep.subr.bf16.mxu1 %v4894_v32  ;;  %v4906_v59 = vld [vmem:[%s6850_s4 + $0x6c] ss:$16 sps:$4 sm:$0xff]   ;;  %v4964_v32 = vld [vmem:[%s6850_s4 + $0x1a8] ss:$16 sps:$4 sm:$0xff]  }
 0x162   : > { %3055 = vmatprep.subr.bf16.mxu0 %v4897_v61  ;;  %v4969_v15 = vld [vmem:[%s6850_s4 + $0x7ac] ss:$16 sps:$4 sm:$0xff]   ;;  %v4967_v61 = vld [vmem:[%s6850_s4 + $0x7a8] ss:$16 sps:$4 sm:$0xff]  }
 0x163   : > { %2933 = vmatpush1.bf16.msra.mxu1 %v4892_v23  ;;  %v4972_v23 = vld [vmem:[%s6850_s4 + $0x1cc] ss:$16 sps:$4 sm:$0xff]  }
 0x164   : > { %3056 = vmatpush1.bf16.msra.mxu0 %v4895_v17  ;;  %2934 = vmatprep.subr.bf16.mxu1 %v4900_v1  ;;  %v4975_v17 = vld [vmem:[%s6850_s4 + $0x7cc] ss:$16 sps:$4 sm:$0xff]   ;;  %v4970_v1 = vld [vmem:[%s6850_s4 + $0x1c8] ss:$16 sps:$4 sm:$0xff]  }
 0x165   : > { %3057 = vmatprep.subr.bf16.mxu0 %v4903_v34  ;;  %v4973_v34 = vld [vmem:[%s6850_s4 + $0x7c8] ss:$16 sps:$4 sm:$0xff]  }
 0x167   : > { %2935 = vmatpush1.bf16.msra.mxu1 %v4898_v40  ;;  %v4978_v40 = vld [vmem:[%s6850_s4 + $0x1ec] ss:$16 sps:$4 sm:$0xff]  }
 0x168   : > { %3058 = vmatpush1.bf16.msra.mxu0 %v4901_v49  ;;  %2936 = vmatprep.subr.bf16.mxu1 %v4906_v59  ;;  %v4981_v49 = vld [vmem:[%s6850_s4 + $0x7ec] ss:$16 sps:$4 sm:$0xff]   ;;  %v4976_v59 = vld [vmem:[%s6850_s4 + $0x1e8] ss:$16 sps:$4 sm:$0xff]  }
 0x169   : > { %3059 = vmatprep.subr.bf16.mxu0 %v4909_v20  ;;  %v4979_v20 = vld [vmem:[%s6850_s4 + $0x7e8] ss:$16 sps:$4 sm:$0xff]  }
 0x16b   : > { %2937 = vmatpush1.bf16.msra.mxu1 %v4904_v25  ;;  %v4984_v25 = vld [vmem:[%s6850_s4 + $0x40c] ss:$16 sps:$4 sm:$0xff]  }
 0x16c   : > { %3060 = vmatpush1.bf16.msra.mxu0 %v4907_v29  ;;  %2938 = vmatprep.subr.bf16.mxu1 %v4912_v38  ;;  %v5068_v29 = vld [vmem:[#allocation2 + $0x4] ss:$8 sps:$4 sm:$0xff]   ;;  %v4982_v38 = vld [vmem:[%s6850_s4 + $0x408] ss:$16 sps:$4 sm:$0xff]  }
 0x16d   : > { %3061 = vmatprep.subr.bf16.mxu0 %v4915_v2  ;;  %v4987_v2 = vld [vmem:[%s6850_s4 + $0x42c] ss:$16 sps:$4 sm:$0xff]  }
 0x16f   : > { %2939 = vmatpush1.bf16.msra.mxu1 %v4910_v50  ;;  %v5066_v50 = vld [vmem:[#allocation2] ss:$8 sps:$4 sm:$0xff]  }
 0x170   : > { %3062 = vmatpush1.bf16.msra.mxu0 %v4913_v63  ;;  %2940 = vmatprep.subr.bf16.mxu1 %v4918_v18  ;;  %v5074_v63 = vld [vmem:[#allocation2 + $0x14] ss:$8 sps:$4 sm:$0xff]   ;;  %v4985_v18 = vld [vmem:[%s6850_s4 + $0x428] ss:$16 sps:$4 sm:$0xff]  }
 0x171   : > { %3063 = vmatprep.subr.bf16.mxu0 %v4921_v5  ;;  %v4990_v5 = vld [vmem:[%s6850_s4 + $0x44c] ss:$16 sps:$4 sm:$0xff]  }
 0x173   : > { %2941 = vmatpush1.bf16.msra.mxu1 %v4916_v26  ;;  %v5072_v26 = vld [vmem:[#allocation2 + $0x10] ss:$8 sps:$4 sm:$0xff]  }
 0x174   : > { %3064 = vmatpush1.bf16.msra.mxu0 %v4919_v30  ;;  %2942 = vmatprep.subr.bf16.mxu1 %v4924_v48  ;;  %v5080_v30 = vld [vmem:[#allocation2 + $0x24] ss:$8 sps:$4 sm:$0xff]   ;;  %v5086_v48 = vld [vmem:[#allocation2 + $0x34] ss:$8 sps:$4 sm:$0xff]  }
 0x175   : > { %3065 = vmatprep.subr.bf16.mxu0 %v4927_v52  ;;  %v4991_v52 = vld [vmem:[%s6850_s4 + $0x468] ss:$16 sps:$4 sm:$0xff]  }
 0x177   : > { %2943 = vmatpush1.bf16.msra.mxu1 %v4922_v33  ;;  %v4996_v33 = vld [vmem:[%s6850_s4 + $0x48c] ss:$16 sps:$4 sm:$0xff]  }
 0x178   : > { %3066 = vmatpush1.bf16.msra.mxu0 %v4925_v53  ;;  %2944 = vmatprep.subr.bf16.mxu1 %v4930_v51  ;;  %v5084_v53 = vld [vmem:[#allocation2 + $0x30] ss:$8 sps:$4 sm:$0xff]   ;;  %v5092_v51 = vld [vmem:[#allocation2 + $0x44] ss:$8 sps:$4 sm:$0xff]  }
 0x179   : > { %3067 = vmatprep.subr.bf16.mxu0 %v4933_v45  ;;  %v4994_v45 = vld [vmem:[%s6850_s4 + $0x488] ss:$16 sps:$4 sm:$0xff]  }
 0x17b   : > { %2945 = vmatpush1.bf16.msra.mxu1 %v4928_v37  ;;  %v4999_v37 = vld [vmem:[%s6850_s4 + $0x4ac] ss:$16 sps:$4 sm:$0xff]  }
 0x17c   : > { %3068 = vmatpush1.bf16.msra.mxu0 %v4931_v14  ;;  %2946 = vmatprep.subr.bf16.mxu1 %v4936_v19  ;;  %v5090_v14 = vld [vmem:[#allocation2 + $0x40] ss:$8 sps:$4 sm:$0xff]   ;;  %v5095_v19 = vld [vmem:[#allocation2 + $0x54] ss:$8 sps:$4 sm:$0xff]  }
 0x17d   : > { %3069 = vmatprep.subr.bf16.mxu0 %v4939_v54  ;;  %v4997_v54 = vld [vmem:[%s6850_s4 + $0x4a8] ss:$16 sps:$4 sm:$0xff]  }
 0x17f   : > { %2947 = vmatpush1.bf16.msra.mxu1 %v4934_v46  ;;  %v5002_v46 = vld [vmem:[%s6850_s4 + $0x4cc] ss:$16 sps:$4 sm:$0xff]  }
 0x180   : > { %3070 = vmatpush1.bf16.msra.mxu0 %v4937_v62  ;;  %2948 = vmatprep.subr.bf16.mxu1 %v4942_v47 }
 0x181   : > { %3071 = vmatprep.subr.bf16.mxu0 %v4945_v44  ;;  %v5093_v44 = vld [vmem:[#allocation2 + $0x50] ss:$8 sps:$4 sm:$0xff]  }
 0x183   : > { %2949 = vmatpush1.bf16.msra.mxu1 %v4940_v12 }
 0x184   : > { %3072 = vmatpush1.bf16.msra.mxu0 %v4943_v16  ;;  %2950 = vmatprep.subr.bf16.mxu1 %v4948_v22  ;;  %v5098_v22 = vld [vmem:[#allocation2 + $0x64] ss:$8 sps:$4 sm:$0xff]  }
 0x185   : > { %3073 = vmatprep.subr.bf16.mxu0 %v4951_v27 }
 0x187   : > { %2951 = vmatpush1.bf16.msra.mxu1 %v4946_v39 }
 0x188   : > { %3074 = vmatpush1.bf16.msra.mxu0 %v4949_v41  ;;  %2952 = vmatprep.subr.bf16.mxu1 %v4954_v55  ;;  %v5000_v41 = vld [vmem:[%s6850_s4 + $0x4c8] ss:$16 sps:$4 sm:$0xff]  }
 0x189   : > { %3075 = vmatprep.subr.bf16.mxu0 %v4957_v28 }
 0x18b   : > { %2953 = vmatpush1.bf16.msra.mxu1 %v4952_v31  ;;  %v5005_v31 = vld [vmem:[%s6850_s4 + $0x4ec] ss:$16 sps:$4 sm:$0xff]  }
 0x18c   : > { %3076 = vmatpush1.bf16.msra.mxu0 %v4955_v36  ;;  %2954 = vmatprep.subr.bf16.mxu1 %v4960_v43  ;;  %v5096_v36 = vld [vmem:[#allocation2 + $0x60] ss:$8 sps:$4 sm:$0xff]   ;;  %v5101_v43 = vld [vmem:[#allocation2 + $0x74] ss:$8 sps:$4 sm:$0xff]  }
 0x18d   : > { %3077 = vmatprep.subr.bf16.mxu0 %v4963_v60  ;;  %v5003_v60 = vld [vmem:[%s6850_s4 + $0x4e8] ss:$16 sps:$4 sm:$0xff]  }
 0x18f   : > { %2955 = vmatpush1.bf16.msra.mxu1 %v4958_v35  ;;  %v5008_v35 = vld [vmem:[%s6850_s4 + $0x50c] ss:$16 sps:$4 sm:$0xff]  }
 0x190   : > { %3078 = vmatpush1.bf16.msra.mxu0 %v4961_v21  ;;  %2956 = vmatprep.subr.bf16.mxu1 %v4966_v8  ;;  %v5099_v21 = vld [vmem:[#allocation2 + $0x70] ss:$8 sps:$4 sm:$0xff]   ;;  %v5104_v8 = vld [vmem:[#allocation2 + $0x84] ss:$8 sps:$4 sm:$0xff]  }
 0x191   : > { %3079 = vmatprep.subr.bf16.mxu0 %v4969_v15  ;;  %v5006_v15 = vld [vmem:[%s6850_s4 + $0x508] ss:$16 sps:$4 sm:$0xff]  }
 0x193   : > { %2957 = vmatpush1.bf16.msra.mxu1 %v4964_v32  ;;  %v5011_v32 = vld [vmem:[%s6850_s4 + $0x52c] ss:$16 sps:$4 sm:$0xff]  }
 0x194   : > { %3080 = vmatpush1.bf16.msra.mxu0 %v4967_v61  ;;  %2958 = vmatprep.subr.bf16.mxu1 %v4972_v23  ;;  %v5102_v61 = vld [vmem:[#allocation2 + $0x80] ss:$8 sps:$4 sm:$0xff]   ;;  %v5107_v23 = vld [vmem:[#allocation2 + $0x94] ss:$8 sps:$4 sm:$0xff]  }
 0x195   : > { %3081 = vmatprep.subr.bf16.mxu0 %v4975_v17  ;;  %v5009_v17 = vld [vmem:[%s6850_s4 + $0x528] ss:$16 sps:$4 sm:$0xff]  }
 0x197   : > { %2959 = vmatpush1.bf16.msra.mxu1 %v4970_v1  ;;  %v5014_v1 = vld [vmem:[%s6850_s4 + $0x54c] ss:$16 sps:$4 sm:$0xff]  }
 0x198   : > { %3082 = vmatpush1.bf16.msra.mxu0 %v4973_v34  ;;  %2960 = vmatprep.subr.bf16.mxu1 %v4978_v40  ;;  %v5105_v34 = vld [vmem:[#allocation2 + $0x90] ss:$8 sps:$4 sm:$0xff]   ;;  %v5110_v40 = vld [vmem:[#allocation2 + $0xa4] ss:$8 sps:$4 sm:$0xff]  }
 0x199   : > { %3083 = vmatprep.subr.bf16.mxu0 %v4981_v49  ;;  %v5012_v49 = vld [vmem:[%s6850_s4 + $0x548] ss:$16 sps:$4 sm:$0xff]  }
 0x19b   : > { %2961 = vmatpush1.bf16.msra.mxu1 %v4976_v59  ;;  %v5017_v59 = vld [vmem:[%s6850_s4 + $0x56c] ss:$16 sps:$4 sm:$0xff]  }
 0x19c   : > { %3084 = vmatpush1.bf16.msra.mxu0 %v4979_v20  ;;  %3012 = vmatprep.subr.bf16.mxu1 %v4984_v25  ;;  %v5108_v20 = vld [vmem:[#allocation2 + $0xa0] ss:$8 sps:$4 sm:$0xff]   ;;  %v5113_v25 = vld [vmem:[#allocation2 + $0xb4] ss:$8 sps:$4 sm:$0xff]  }
 0x19d   : > { %3761 = vmatprep.subr.bf16.mxu0 %v5068_v29  ;;  %v5015_v29 = vld [vmem:[%s6850_s4 + $0x568] ss:$16 sps:$4 sm:$0xff]  }
 0x19e   : > { %2963 = vmatmul.mubr.bf16.vlgmr.msra.gmra.mrb[12].mxu1 %v5753_v56  ;;  %v4988_v56 = vld [vmem:[%s6850_s4 + $0x448] ss:$16 sps:$4 sm:$0xff]  }
 0x19f   : > { %3086 = vmatmul.mubr.bf16.vlgmr.msra.gmra.mrb[12].mxu0 %v6222_v13  ;;  %3013 = vmatpush1.bf16.msra.mxu1 %v4982_v38  ;;  %v4993_v13 = vld [vmem:[%s6850_s4 + $0x46c] ss:$16 sps:$4 sm:$0xff]  }
 0x1a0   : > { %3044 = vmatprep.mubr.bf16.mxu1 %v5751_v42  ;;  %3014 = vmatprep.subr.bf16.mxu1 %v4987_v2  ;;  %v5078_v42 = vld [vmem:[#allocation2 + $0x20] ss:$8 sps:$4 sm:$0xff]   ;;  %v5020_v38 = vld [vmem:[%s6850_s4 + $0x58c] ss:$16 sps:$4 sm:$0xff]   ;;  %v5111_v2 = vld [vmem:[#allocation2 + $0xb0] ss:$8 sps:$4 sm:$0xff]  }
 0x1a1   : > { %3762 = vmatpush1.bf16.msra.mxu0 %v5066_v50  ;;  %v5116_v50 = vld [vmem:[#allocation2 + $0xc4] ss:$8 sps:$4 sm:$0xff]  }
 0x1a2   : > { %3763 = vmatprep.subr.bf16.mxu0 %v5074_v63  ;;  %v5018_v63 = vld [vmem:[%s6850_s4 + $0x588] ss:$16 sps:$4 sm:$0xff]  }
 0x1a3   : > { %3015 = vmatpush1.bf16.msra.mxu1 %v4985_v18  ;;  %v5023_v18 = vld [vmem:[%s6850_s4 + $0x5ac] ss:$16 sps:$4 sm:$0xff]  }
 0x1a4   : > { %3016 = vmatprep.subr.bf16.mxu1 %v4990_v5  ;;  %v5114_v5 = vld [vmem:[#allocation2 + $0xc0] ss:$8 sps:$4 sm:$0xff]  }
 0x1a5   : > { %3764 = vmatpush1.bf16.msra.mxu0 %v5072_v26  ;;  %v5119_v26 = vld [vmem:[#allocation2 + $0xd4] ss:$8 sps:$4 sm:$0xff]  }
 0x1a6   : > { %3765 = vmatprep.subr.bf16.mxu0 %v5080_v30  ;;  %v5021_v30 = vld [vmem:[%s6850_s4 + $0x5a8] ss:$16 sps:$4 sm:$0xff]  }
 0x1a7   : > { %3017 = vmatpush1.bf16.msra.mxu1 %v4988_v56  ;;  %v5026_v56 = vld [vmem:[%s6850_s4 + $0x5cc] ss:$16 sps:$4 sm:$0xff]  }
 0x1a8   : > { %3018 = vmatprep.subr.bf16.mxu1 %v4993_v13  ;;  %v5117_v13 = vld [vmem:[#allocation2 + $0xd0] ss:$8 sps:$4 sm:$0xff]  }
 0x1a9   : > { %3766 = vmatpush1.bf16.msra.mxu0 %v5078_v42  ;;  %v5122_v42 = vld [vmem:[#allocation2 + $0xe4] ss:$8 sps:$4 sm:$0xff]  }
 0x1aa   : > { %3767 = vmatprep.subr.bf16.mxu0 %v5086_v48  ;;  %v5024_v48 = vld [vmem:[%s6850_s4 + $0x5c8] ss:$16 sps:$4 sm:$0xff]  }
 0x1ab   : > { %3019 = vmatpush1.bf16.msra.mxu1 %v4991_v52  ;;  %v5029_v52 = vld [vmem:[%s6850_s4 + $0x5ec] ss:$16 sps:$4 sm:$0xff]  }
 0x1ac   : > { %3020 = vmatprep.subr.bf16.mxu1 %v4996_v33  ;;  %v5120_v33 = vld [vmem:[#allocation2 + $0xe0] ss:$8 sps:$4 sm:$0xff]  }
 0x1ad   : > { %3768 = vmatpush1.bf16.msra.mxu0 %v5084_v53  ;;  %v5125_v53 = vld [vmem:[#allocation2 + $0xf4] ss:$8 sps:$4 sm:$0xff]  }
 0x1ae   : > { %3769 = vmatprep.subr.bf16.mxu0 %v5092_v51  ;;  %v5027_v51 = vld [vmem:[%s6850_s4 + $0x5e8] ss:$16 sps:$4 sm:$0xff]  }
 0x1af   : > { %3021 = vmatpush1.bf16.msra.mxu1 %v4994_v45  ;;  %v5032_v45 = vld [vmem:[%s6850_s4 + $0x80c] ss:$16 sps:$4 sm:$0xff]  }
 0x1b0   : > { %3022 = vmatprep.subr.bf16.mxu1 %v4999_v37  ;;  %v5123_v37 = vld [vmem:[#allocation2 + $0xf0] ss:$8 sps:$4 sm:$0xff]  }
 0x1b1   : > { %v6453_v62 = vpop.f32.mrb[0].mxu1  ;;  %v6455_v47 = vpop.f32.mrb[0].mxu0  ;;  %3770 = vmatpush1.bf16.msra.mxu0 %v5090_v14  ;;  %v5030_v14 = vld [vmem:[%s6850_s4 + $0x808] ss:$16 sps:$4 sm:$0xff]  }
 0x1b2   : > { %v6457_v12 = vpop.f32.mrb[1].mxu1  ;;  %v6459_v16 = vpop.f32.mrb[1].mxu0  ;;  %3771 = vmatprep.subr.bf16.mxu0 %v5095_v19  ;;  %v5035_v19 = vld [vmem:[%s6850_s4 + $0x82c] ss:$16 sps:$4 sm:$0xff]  }
 0x1b3   : > { %3023 = vmatpush1.bf16.msra.mxu1 %v4997_v54  ;;  %v2763_v27 = vpop.f32.mrb[2].mxu1  ;;  %v2845_v39 = vpop.f32.mrb[2].mxu0  ;;  %v5033_v54 = vld [vmem:[%s6850_s4 + $0x828] ss:$16 sps:$4 sm:$0xff]  }
 0x1b4   : > { %v2764_v55 = vpop.f32.mrb[3].mxu1  ;;  %v2846_v28 = vpop.f32.mrb[3].mxu0  ;;  %3024 = vmatprep.subr.bf16.mxu1 %v5002_v46  ;;  %v5038_v46 = vld [vmem:[%s6850_s4 + $0x84c] ss:$16 sps:$4 sm:$0xff]   ;;  %v5039_v27 = vld [vmem:[%s6850_s4 + $0x868] ss:$16 sps:$4 sm:$0xff]  }
 0x1b5   : > { %3772 = vmatpush1.bf16.msra.mxu0 %v5093_v44  ;;  %v5036_v44 = vld [vmem:[%s6850_s4 + $0x848] ss:$16 sps:$4 sm:$0xff]   ;;  %v6559_v55 = vpop.permute.xlu1 %1102 }
 0x1b6   : > { %3773 = vmatprep.subr.bf16.mxu0 %v5098_v22  ;;  %v6549_v22 = vld [vmem:[%s6851_s5 + $0x8] sm:$0xff] }
 0x1b7   : > { %3025 = vmatpush1.bf16.msra.mxu1 %v5000_v41  ;;  %v5044_v41 = vld [vmem:[%s6850_s4 + $0x88c] ss:$16 sps:$4 sm:$0xff]   ;;  %v1112_v28 = vrot.slane %v6549_v22, %v5603_v4 }
 0x1b8   : > { %3026 = vmatprep.subr.bf16.mxu1 %v5005_v31  ;;  %v5042_v31 = vld [vmem:[%s6850_s4 + $0x888] ss:$16 sps:$4 sm:$0xff]  }
 0x1b9   : > { %3774 = vmatpush1.bf16.msra.mxu0 %v5096_v36 }
 0x1ba   : > { %3775 = vmatprep.subr.bf16.mxu0 %v5101_v43  ;;  %v5047_v43 = vld [vmem:[%s6850_s4 + $0x8ac] ss:$16 sps:$4 sm:$0xff]  }
 0x1bb   : > { %3027 = vmatpush1.bf16.msra.mxu1 %v5003_v60  ;;  %v1122_v60 = vmul.f32 %v1112_v28, %v6559_v55 }
 0x1bc   : > { %3028 = vmatprep.subr.bf16.mxu1 %v5008_v35  ;;  %v5045_v35 = vld [vmem:[%s6850_s4 + $0x8a8] ss:$16 sps:$4 sm:$0xff]  }
 0x1bd   : > { %3776 = vmatpush1.bf16.msra.mxu0 %v5099_v21 }
 0x1be   : > { %3777 = vmatprep.subr.bf16.mxu0 %v5104_v8  ;;  %v5050_v8 = vld [vmem:[%s6850_s4 + $0x8cc] ss:$16 sps:$4 sm:$0xff]  }
 0x1bf   : > { %3029 = vmatpush1.bf16.msra.mxu1 %v5006_v15  ;;  %v2762_v15 = vadd.f32 %v6457_v12, %v1122_v60  ;;  %v5053_v12 = vld [vmem:[%s6850_s4 + $0x8ec] ss:$16 sps:$4 sm:$0xff]  }
 0x1c0   : > { %3030 = vmatprep.subr.bf16.mxu1 %v5011_v32 }
 0x1c1   : > { %3778 = vmatpush1.bf16.msra.mxu0 %v5102_v61 }
 0x1c2   : > { %3779 = vmatprep.subr.bf16.mxu0 %v5107_v23 }
 0x1c3   : > { %3031 = vmatpush1.bf16.msra.mxu1 %v5009_v17 }
 0x1c4   : > { %3032 = vmatprep.subr.bf16.mxu1 %v5014_v1 }
 0x1c5   : > { %3780 = vmatpush1.bf16.msra.mxu0 %v5105_v34 }
 0x1c6   : > { %3781 = vmatprep.subr.bf16.mxu0 %v5110_v40 }
 0x1c7   : > { %3033 = vmatpush1.bf16.msra.mxu1 %v5012_v49 }
 0x1c8   : > { %3034 = vmatprep.subr.bf16.mxu1 %v5017_v59 }
 0x1c9   : > { %3782 = vmatpush1.bf16.msra.mxu0 %v5108_v20 }
 0x1ca   : > { %3783 = vmatprep.subr.bf16.mxu0 %v5113_v25 }
 0x1cb   : > { %3035 = vmatpush1.bf16.msra.mxu1 %v5015_v29 }
 0x1cc   : > { %3036 = vmatprep.subr.bf16.mxu1 %v5020_v38  ;;  %v5051_v38 = vld [vmem:[%s6850_s4 + $0x8e8] ss:$16 sps:$4 sm:$0xff]  }
 0x1cd   : > { %3784 = vmatpush1.bf16.msra.mxu0 %v5111_v2  ;;  %v5056_v2 = vld [vmem:[%s6850_s4 + $0x90c] ss:$16 sps:$4 sm:$0xff]  }
 0x1ce   : > { %3785 = vmatprep.subr.bf16.mxu0 %v5116_v50  ;;  %v5054_v50 = vld [vmem:[%s6850_s4 + $0x908] ss:$16 sps:$4 sm:$0xff]  }
 0x1cf   : > { %3037 = vmatpush1.bf16.msra.mxu1 %v5018_v63  ;;  %v5062_v63 = vld [vmem:[%s6850_s4 + $0x94c] ss:$16 sps:$4 sm:$0xff]  }
 0x1d0   : > { %3038 = vmatprep.subr.bf16.mxu1 %v5023_v18  ;;  %v5060_v18 = vld [vmem:[%s6850_s4 + $0x948] ss:$16 sps:$4 sm:$0xff]  }
 0x1d1   : > { %3786 = vmatpush1.bf16.msra.mxu0 %v5114_v5  ;;  %v5065_v5 = vld [vmem:[%s6850_s4 + $0x96c] ss:$16 sps:$4 sm:$0xff]  }
 0x1d2   : > { %3787 = vmatprep.subr.bf16.mxu0 %v5119_v26  ;;  %v5063_v26 = vld [vmem:[%s6850_s4 + $0x968] ss:$16 sps:$4 sm:$0xff]  }
 0x1d3   : > { %3039 = vmatpush1.bf16.msra.mxu1 %v5021_v30  ;;  %v5071_v30 = vld [vmem:[%s6850_s4 + $0x98c] ss:$16 sps:$4 sm:$0xff]  }
 0x1d4   : > { %3040 = vmatprep.subr.bf16.mxu1 %v5026_v56  ;;  %v5069_v56 = vld [vmem:[%s6850_s4 + $0x988] ss:$16 sps:$4 sm:$0xff]  }
 0x1d5   : > { %3788 = vmatpush1.bf16.msra.mxu0 %v5117_v13  ;;  %v5077_v13 = vld [vmem:[%s6850_s4 + $0x9ac] ss:$16 sps:$4 sm:$0xff]  }
 0x1d6   : > { %3789 = vmatprep.subr.bf16.mxu0 %v5122_v42  ;;  %v5075_v42 = vld [vmem:[%s6850_s4 + $0x9a8] ss:$16 sps:$4 sm:$0xff]  }
 0x1d7   : > { %3041 = vmatpush1.bf16.msra.mxu1 %v5024_v48  ;;  %v5083_v48 = vld [vmem:[%s6850_s4 + $0x9cc] ss:$16 sps:$4 sm:$0xff]  }
 0x1d8   : > { %3042 = vmatprep.subr.bf16.mxu1 %v5029_v52  ;;  %v5081_v52 = vld [vmem:[%s6850_s4 + $0x9c8] ss:$16 sps:$4 sm:$0xff]  }
 0x1d9   : > { %3790 = vmatpush1.bf16.msra.mxu0 %v5120_v33  ;;  %v5089_v33 = vld [vmem:[%s6850_s4 + $0x9ec] ss:$16 sps:$4 sm:$0xff]  }
 0x1da   : > { %3791 = vmatprep.subr.bf16.mxu0 %v5125_v53  ;;  %v5087_v53 = vld [vmem:[%s6850_s4 + $0x9e8] ss:$16 sps:$4 sm:$0xff]  }
 0x1db   : > { %3043 = vmatpush1.bf16.msra.mxu1 %v5027_v51  ;;  %v6642_v51 = vpop.permute.xlu1 %3164 }
 0x1dc   : > { %3094 = vmatprep.subr.bf16.mxu1 %v5032_v45 }
 0x1dd   : > { %3792 = vmatpush1.bf16.msra.mxu0 %v5123_v37 }
 0x1de   : > { %3045 = vmatmul.mubr.bf16.vlgmr.msra.gmra.mrb[16].mxu1 %v5755_v57  ;;  %v5041_v57 = vld [vmem:[%s6850_s4 + $0x86c] ss:$16 sps:$4 sm:$0xff]  }
 0x1df   : > { %3095 = vmatpush1.bf16.msra.mxu1 %v5030_v14  ;;  %3126 = vmatprep.mubr.bf16.mxu1 %v5784_v24  ;;  %v6544_v24 = vld [vmem:[%s6851_s5] sm:$0xff]  ;;  %v6645_v45 = vpop.permute.xlu1 %3192 }
 0x1e0   : > { %3096 = vmatprep.subr.bf16.mxu1 %v5035_v19  ;;  %v1108_v39 = vrot.slane %v6544_v24, %v5603_v4  ;;  %v3142_v14 = vrot.slane %v6544_v24, %v5589_v0  ;;  %v3146_v19 = vrot.slane %v6549_v22, %v5589_v0 }
 0x1e2   : > { %v1121_v36 = vmul.f32 %v1108_v39, %v6559_v55 }
 0x1e3   : > { %3097 = vmatpush1.bf16.msra.mxu1 %v5033_v54  ;;  %v6647_v37 = vpop.permute.xlu1 %3220  ;;  %v6653_v54 = vpop.permute.xlu0 %3136 }
 0x1e4   : > { %3098 = vmatprep.subr.bf16.mxu1 %v5038_v46  ;;  %v2760_v21 = vadd.f32 %v6453_v62, %v1121_v36  ;;  %v5048_v62 = vld [vmem:[%s6850_s4 + $0x8c8] ss:$16 sps:$4 sm:$0xff]   ;;  %v3202_v36 = vrot.slane %v6549_v22, %v5612_v7 }
 0x1e7   : > { %3099 = vmatpush1.bf16.msra.mxu1 %v5036_v44  ;;  %v6655_v46 = vpop.permute.xlu1 %3248  ;;  %v3170_v44 = vrot.slane %v6544_v24, %v5616_v9 }
 0x1e8   : > { %3100 = vmatprep.subr.bf16.mxu1 %v5041_v57 }
 0x1eb   : > { %3101 = vmatpush1.bf16.msra.mxu1 %v5039_v27  ;;  %v3198_v27 = vrot.slane %v6544_v24, %v5612_v7 }
 0x1ec   : > { %3102 = vmatprep.subr.bf16.mxu1 %v5044_v41 }
 0x1ef   : > { %3103 = vmatpush1.bf16.msra.mxu1 %v5042_v31  ;;  %v3155_v31 = vmul.f32 %v3142_v14, %v6653_v54 }
 0x1f0   : > { %3104 = vmatprep.subr.bf16.mxu1 %v5047_v43 }
 0x1f1   : > { %v2800_v32 = vpop.f32.mrb[4].mxu1  ;;  %v6579_v61 = vpop.f32.mrb[4].mxu0 }
 0x1f2   : > { %v2801_v23 = vadd.f32 %v2800_v32, %v2760_v21  ;;  %v2802_v17 = vpop.f32.mrb[5].mxu1  ;;  %v6581_v1 = vpop.f32.mrb[5].mxu0  ;;  %v3226_v32 = vrot.slane %v6544_v24, %v5610_v6 }
 0x1f3   : > { %v2803_v34 = vadd.f32 %v2802_v17, %v2762_v15  ;;  %v2804_v40 = vpop.f32.mrb[6].mxu1  ;;  %v2927_v49 = vpop.f32.mrb[6].mxu0  ;;  %3105 = vmatpush1.bf16.msra.mxu1 %v5045_v35  ;;  %v3156_v35 = vmul.f32 %v3146_v19, %v6653_v54  ;;  %v6706_v19 = vld [vmem:[%s6852_s6] sm:$0xf] }
 0x1f4   : > { %v2805_v59 = vpop.f32.mrb[7].mxu1  ;;  %v2928_v20 = vpop.f32.mrb[7].mxu0  ;;  %3106 = vmatprep.subr.bf16.mxu1 %v5050_v8  ;;  %v2842_v25 = vadd.f32 %v6455_v47, %v2801_v23  ;;  %v5059_v47 = vld [vmem:[%s6850_s4 + $0x92c] ss:$16 sps:$4 sm:$0xff]   ;;  %v3183_v8 = vmul.f32 %v3170_v44, %v6642_v51 }
 0x1f5   : > { %v2844_v29 = vadd.f32 %v6459_v16, %v2803_v34  ;;  %v5057_v16 = vld [vmem:[%s6850_s4 + $0x928] ss:$16 sps:$4 sm:$0xff]   ;;  %v5128_v34 = vld [vmem:[#allocation2 + $0x104] ss:$8 sps:$4 sm:$0xff]   ;;  %v6679_v20 = vpop.permute.xlu1 %3276 }
 0x1f6   : > { %3802 = vmatprep.subr.bf16.mxu0 %v5128_v34  ;;  %v5129_v34 = vld [vmem:[#allocation2 + $0x110] ss:$8 sps:$4 sm:$0xff]  }
 0x1f7   : > { %3107 = vmatpush1.bf16.msra.mxu1 %v5048_v62  ;;  %v3230_v62 = vrot.slane %v6549_v22, %v5610_v6 }
 0x1f8   : > { %3108 = vmatprep.subr.bf16.mxu1 %v5053_v12  ;;  %v3211_v12 = vmul.f32 %v3198_v27, %v6645_v45 }
 0x1fb   : > { %3109 = vmatpush1.bf16.msra.mxu1 %v5051_v38 }
 0x1fc   : > { %3110 = vmatprep.subr.bf16.mxu1 %v5056_v2  ;;  %v3258_v2 = vrot.slane %v6549_v22, %v5601_v3 }
 0x1ff   : > { %3111 = vmatpush1.bf16.msra.mxu1 %v5054_v50 }
 0x200   : > { %3112 = vmatprep.subr.bf16.mxu1 %v5059_v47  ;;  %v3282_v47 = vrot.slane %v6544_v24, %v5620_v11 }
 0x203   : > { %3113 = vmatpush1.bf16.msra.mxu1 %v5057_v16  ;;  %v3240_v16 = vmul.f32 %v3230_v62, %v6647_v37  ;;  %v5137_v62 = vld [vmem:[#allocation2 + $0x134] ss:$8 sps:$4 sm:$0xff]  }
 0x204   : > { %3114 = vmatprep.subr.bf16.mxu1 %v5062_v63 }
 0x207   : > { %3115 = vmatpush1.bf16.msra.mxu1 %v5060_v18  ;;  %v3286_v18 = vrot.slane %v6549_v22, %v5620_v11 }
 0x208   : > { %3116 = vmatprep.subr.bf16.mxu1 %v5065_v5 }
 0x209   : > { %v3296_v14 = vmul.f32 %v3286_v18, %v6679_v20  ;;  %v5150_v18 = vld [vmem:[#allocation2 + $0x180] ss:$8 sps:$4 sm:$0xff]  }
 0x20b   : > { %3117 = vmatpush1.bf16.msra.mxu1 %v5063_v26 }
 0x20c   : > { %3118 = vmatprep.subr.bf16.mxu1 %v5071_v30  ;;  %v3310_v30 = vrot.slane %v6544_v24, %v5618_v10 }
 0x20f   : > { %3119 = vmatpush1.bf16.msra.mxu1 %v5069_v56 }
 0x210   : > { %3120 = vmatprep.subr.bf16.mxu1 %v5077_v13  ;;  %v3268_v13 = vmul.f32 %v3258_v2, %v6655_v46  ;;  %v5144_v2 = vld [vmem:[#allocation2 + $0x160] ss:$8 sps:$4 sm:$0xff]  }
 0x213   : > { %3121 = vmatpush1.bf16.msra.mxu1 %v5075_v42  ;;  %v3314_v42 = vrot.slane %v6549_v22, %v5618_v10 }
 0x214   : > { %3122 = vmatprep.subr.bf16.mxu1 %v5083_v48  ;;  %v6699_v48 = vpop.permute.xlu1 %3304 }
 0x215   : > { %v3323_v44 = vmul.f32 %v3310_v30, %v6699_v48 }
 0x217   : > { %3123 = vmatpush1.bf16.msra.mxu1 %v5081_v52 }
 0x218   : > { %3124 = vmatprep.subr.bf16.mxu1 %v5089_v33  ;;  %v3295_v33 = vmul.f32 %v3282_v47, %v6679_v20  ;;  %v5152_v47 = vld [vmem:[#allocation2 + $0x184] ss:$8 sps:$4 sm:$0xff]  }
 0x21b   : > { %3125 = vmatpush1.bf16.msra.mxu1 %v5087_v53 }
 0x21e   : > { %3127 = vmatmul.mubr.bf16.vlgmr.msra.gmra.mrb[20].mxu1 %v6015_v58  ;;  %v3174_v58 = vrot.slane %v6549_v22, %v5616_v9  ;;  %v3336_v22 = vrot.slane %v6706_v19, %v5603_v4 }
 0x220   : > { %v3184_v40 = vmul.f32 %v3174_v58, %v6642_v51 }
 0x231   : > { %v2882_v57 = vpop.f32.mrb[8].mxu1 }
 0x232   : > { %v2883_v39 = vadd.f32 %v2882_v57, %v2842_v25  ;;  %v6663_v41 = vpop.f32.mrb[8].mxu0  ;;  %v2884_v28 = vpop.f32.mrb[9].mxu1  ;;  %v3324_v57 = vmul.f32 %v3314_v42, %v6699_v48 }
 0x233   : > { %v2885_v43 = vadd.f32 %v2884_v28, %v2844_v29  ;;  %v6668_v60 = vpop.f32.mrb[9].mxu0  ;;  %v2886_v21 = vpop.f32.mrb[10].mxu1  ;;  %v3212_v29 = vmul.f32 %v3202_v36, %v6645_v45  ;;  %v3340_v28 = vrot.slane %v6706_v19, %v5589_v0 }
 0x234   : > { %v2924_v15 = vadd.f32 %v6579_v61, %v2883_v39  ;;  %v3009_v23 = vpop.f32.mrb[10].mxu0  ;;  %v2887_v17 = vpop.f32.mrb[11].mxu1  ;;  %v3254_v61 = vrot.slane %v6544_v24, %v5601_v3 }
 0x235   : > { %v2926_v49 = vadd.f32 %v6581_v1, %v2885_v43  ;;  %v3010_v59 = vpop.f32.mrb[11].mxu0  ;;  %v3239_v1 = vmul.f32 %v3226_v32, %v6647_v37  ;;  %v5126_v32 = vld [vmem:[#allocation2 + $0x100] ss:$8 sps:$4 sm:$0xff]   ;;  %v5131_v17 = vld [vmem:[#allocation2 + $0x114] ss:$8 sps:$4 sm:$0xff]  }
 0x236   : > { %v3159_v25 = vadd.f32 %v3155_v31, %v2924_v15  ;;  %v3267_v26 = vmul.f32 %v3254_v61, %v6655_v46  ;;  %v5135_v59 = vld [vmem:[#allocation2 + $0x130] ss:$8 sps:$4 sm:$0xff]   ;;  %v5143_v61 = vld [vmem:[#allocation2 + $0x154] ss:$8 sps:$4 sm:$0xff]  }
 0x237   : > { %v3160_v38 = vadd.f32 %v3156_v35, %v2926_v49  ;;  %v5132_v49 = vld [vmem:[#allocation2 + $0x120] ss:$8 sps:$4 sm:$0xff]  }
 0x238   : > { %v3187_v50 = vadd.f32 %v3183_v8, %v3159_v25  ;;  %v5138_v25 = vld [vmem:[#allocation2 + $0x140] ss:$8 sps:$4 sm:$0xff]  }
 0x239   : > { %v3188_v63 = vadd.f32 %v3184_v40, %v3160_v38  ;;  %v5134_v40 = vld [vmem:[#allocation2 + $0x124] ss:$8 sps:$4 sm:$0xff]  }
 0x23a   : > { %v3215_v5 = vadd.f32 %v3211_v12, %v3187_v50  ;;  %v5140_v12 = vld [vmem:[#allocation2 + $0x144] ss:$8 sps:$4 sm:$0xff]   ;;  %v5147_v50 = vld [vmem:[#allocation2 + $0x170] ss:$8 sps:$4 sm:$0xff]  }
 0x23b   : > { %v3216_v56 = vadd.f32 %v3212_v29, %v3188_v63  ;;  %v5141_v29 = vld [vmem:[#allocation2 + $0x150] ss:$8 sps:$4 sm:$0xff]   ;;  %v5146_v38 = vld [vmem:[#allocation2 + $0x164] ss:$8 sps:$4 sm:$0xff]  }
 0x23c   : > { %v3243_v52 = vadd.f32 %v3239_v1, %v3215_v5  ;;  %v5149_v1 = vld [vmem:[#allocation2 + $0x174] ss:$8 sps:$4 sm:$0xff]  }
 0x23d   : > { %v3244_v53 = vadd.f32 %v3240_v16, %v3216_v56  ;;  %v6717_v16 = vld [vmem:[%s6851_s5 + $0x10] sm:$0xff]  ;;  %v6722_v63 = vld [vmem:[%s6851_s5 + $0x18] sm:$0xff] }
 0x23e   : > { %v3271_v24 = vadd.f32 %v3267_v26, %v3243_v52  ;;  %v1116_v5 = vrot.slane %v6717_v16, %v5603_v4  ;;  %v5155_v26 = vld [vmem:[#allocation2 + $0x194] ss:$8 sps:$4 sm:$0xff]   ;;  %v1120_v30 = vrot.slane %v6722_v63, %v5603_v4  ;;  %v5153_v56 = vld [vmem:[#allocation2 + $0x190] ss:$8 sps:$4 sm:$0xff]  }
 0x23f   : > { %v3272_v58 = vadd.f32 %v3268_v13, %v3244_v53 }
 0x240   : > { %v3299_v27 = vadd.f32 %v3295_v33, %v3271_v24  ;;  %v1123_v13 = vmul.f32 %v1116_v5, %v6559_v55  ;;  %v1124_v42 = vmul.f32 %v1120_v30, %v6559_v55  ;;  %v5159_v55 = vld [vmem:[#allocation2 + $0x1b0] ss:$8 sps:$4 sm:$0xff]  }
 0x241   : > { %v3300_v39 = vadd.f32 %v3296_v14, %v3272_v58 }
 0x242   : > { %v3327_v31 = vadd.f32 %v3323_v44, %v3299_v27 }
 0x243   : > { %v3328_v36 = vadd.f32 %v3324_v57, %v3300_v39 }
 0x244   : > { %v3353_v43 = vadd.f32 %v3336_v22, %v3327_v31  ;;  %v5156_v31 = vld [vmem:[#allocation2 + $0x1a0] ss:$8 sps:$4 sm:$0xff]  }
 0x245   : > { %v3354_v35 = vadd.f32 %v3340_v28, %v3328_v36  ;;  %v5158_v36 = vld [vmem:[#allocation2 + $0x1a4] ss:$8 sps:$4 sm:$0xff]  }
 0x246   : > { %v3357_v21 = vmax.f32 %v3353_v43, 0.0  ;;  %v5161_v43 = vld [vmem:[#allocation2 + $0x1b4] ss:$8 sps:$4 sm:$0xff]  }
 0x247   : > { %v3358_v8 = vmax.f32 %v3354_v35, 0.0  ;;  %v5164_v35 = vld [vmem:[#allocation2 + $0x1c4] ss:$8 sps:$4 sm:$0xff]  }
 0x248   : > { %v3361_v23 = vpack.c.bf16 %v3357_v21, %v3357_v21  ;;  %v5162_v21 = vld [vmem:[#allocation2 + $0x1c0] ss:$8 sps:$4 sm:$0xff]  }
 0x249   : > { %v3362_v15 = vpack.c.bf16 %v3358_v8, %v3358_v8  ;;  %v5167_v8 = vld [vmem:[#allocation2 + $0x1d4] ss:$8 sps:$4 sm:$0xff]  }
 0x24b   : > { %3793 = vmatprep.mubr.bf16.mxu0 %v3362_v15  ;;  %v5165_v15 = vld [vmem:[#allocation2 + $0x1d0] ss:$8 sps:$4 sm:$0xff]  }
 0x24c   : > { %3794 = vmatmul.mubr.bf16.vlgmr.msra.gmra.mrb[16].mxu0 %v3361_v23  ;;  %v5176_v23 = vld [vmem:[%s6855_s9 + $0x48] sm:$0xff]  }
 0x24d   : > { %3803 = vmatpush1.bf16.msra.mxu0 %v5126_v32  ;;  %v5170_v32 = vld [vmem:[#allocation2 + $0x1e4] ss:$8 sps:$4 sm:$0xff]  }
 0x24e   : > { %3804 = vmatprep.subr.bf16.mxu0 %v5131_v17  ;;  %v5168_v17 = vld [vmem:[#allocation2 + $0x1e0] ss:$8 sps:$4 sm:$0xff]  }
 0x251   : > { %3805 = vmatpush1.bf16.msra.mxu0 %v5129_v34  ;;  %v5173_v34 = vld [vmem:[#allocation2 + $0x1f4] ss:$8 sps:$4 sm:$0xff]  }
 0x252   : > { %3806 = vmatprep.subr.bf16.mxu0 %v5134_v40  ;;  %v5177_v40 = vld [vmem:[%s6855_s9 + $0x8] sm:$0xff]  }
 0x255   : > { %3807 = vmatpush1.bf16.msra.mxu0 %v5132_v49  ;;  %v5178_v49 = vld [vmem:[%s6855_s9 + $0x50] sm:$0xff]  }
 0x256   : > { %3808 = vmatprep.subr.bf16.mxu0 %v5137_v62  ;;  %v5171_v62 = vld [vmem:[#allocation2 + $0x1f0] ss:$8 sps:$4 sm:$0xff]  }
 0x259   : > { %3809 = vmatpush1.bf16.msra.mxu0 %v5135_v59  ;;  %v5179_v59 = vld [vmem:[%s6855_s9 + $0x10] sm:$0xff]  }
 0x25a   : > { %3810 = vmatprep.subr.bf16.mxu0 %v5140_v12  ;;  %v5180_v12 = vld [vmem:[%s6855_s9 + $0x58] sm:$0xff]  }
 0x25d   : > { %3811 = vmatpush1.bf16.msra.mxu0 %v5138_v25  ;;  %v5181_v25 = vld [vmem:[%s6855_s9 + $0x18] sm:$0xff]  }
 0x25e   : > { %3812 = vmatprep.subr.bf16.mxu0 %v5143_v61  ;;  %v5182_v61 = vld [vmem:[%s6855_s9 + $0x60] sm:$0xff]  }
 0x261   : > { %3813 = vmatpush1.bf16.msra.mxu0 %v5141_v29  ;;  %v5183_v29 = vld [vmem:[%s6855_s9 + $0x20] sm:$0xff]  }
 0x262   : > { %3814 = vmatprep.subr.bf16.mxu0 %v5146_v38  ;;  %v5184_v38 = vld [vmem:[%s6855_s9 + $0x68] sm:$0xff]  }
 0x265   : > { %3815 = vmatpush1.bf16.msra.mxu0 %v5144_v2  ;;  %v5185_v2 = vld [vmem:[%s6855_s9 + $0x28] sm:$0xff]  }
 0x266   : > { %3816 = vmatprep.subr.bf16.mxu0 %v5149_v1 }
 0x269   : > { %3817 = vmatpush1.bf16.msra.mxu0 %v5147_v50 }
 0x26a   : > { %3818 = vmatprep.subr.bf16.mxu0 %v5152_v47 }
 0x26d   : > { %3819 = vmatpush1.bf16.msra.mxu0 %v5150_v18 }
 0x26e   : > { %3820 = vmatprep.subr.bf16.mxu0 %v5155_v26 }
 0x271   : > { %v2964_v52 = vpop.f32.mrb[12].mxu1  ;;  %3821 = vmatpush1.bf16.msra.mxu0 %v5153_v56 }
 0x272   : > { %v2965_v33 = vadd.f32 %v2964_v52, %v1123_v13  ;;  %v6730_v53 = vpop.f32.mrb[12].mxu0  ;;  %v2966_v14 = vpop.f32.mrb[13].mxu1  ;;  %3822 = vmatprep.subr.bf16.mxu0 %v5158_v36  ;;  %v3150_v13 = vrot.slane %v6717_v16, %v5589_v0  ;;  %v3178_v52 = vrot.slane %v6717_v16, %v5616_v9 }
 0x273   : > { %v2967_v24 = vadd.f32 %v2966_v14, %v1124_v42  ;;  %v3089_v44 = vpop.f32.mrb[13].mxu0  ;;  %v2968_v58 = vpop.f32.mrb[14].mxu1  ;;  %v3154_v42 = vrot.slane %v6722_v63, %v5589_v0 }
 0x274   : > { %v3091_v57 = vpop.f32.mrb[14].mxu0  ;;  %v2969_v22 = vpop.f32.mrb[15].mxu1  ;;  %v3006_v27 = vadd.f32 %v6663_v41, %v2965_v33  ;;  %v5174_v41 = vld [vmem:[%s6855_s9 + $0x40] sm:$0xff]   ;;  %v3182_v33 = vrot.slane %v6722_v63, %v5616_v9  ;;  %v3157_v58 = vmul.f32 %v3150_v13, %v6653_v54 }
 0x275   : > { %v3092_v39 = vpop.f32.mrb[15].mxu0  ;;  %v3008_v28 = vadd.f32 %v6668_v60, %v2967_v24  ;;  %3823 = vmatpush1.bf16.msra.mxu0 %v5156_v31  ;;  %v5175_v60 = vld [vmem:[%s6855_s9] sm:$0xff]   ;;  %4531 = vmatprep.subr.bf16.mxu1 %v5174_v41  ;;  %v3206_v24 = vrot.slane %v6717_v16, %v5612_v7  ;;  %v3210_v57 = vrot.slane %v6722_v63, %v5612_v7 }
 0x276   : > { %3824 = vmatprep.subr.bf16.mxu0 %v5161_v43  ;;  %4532 = vmatpush3.bf16.msra.mxu1 %v5175_v60  ;;  %v3158_v22 = vmul.f32 %v3154_v42, %v6653_v54  ;;  %v3234_v31 = vrot.slane %v6717_v16, %v5610_v6  ;;  %v3262_v54 = vrot.slane %v6717_v16, %v5601_v3 }
 0x277   : > { %4533 = vmatprep.subr.bf16.mxu1 %v5176_v23  ;;  %v3266_v41 = vrot.slane %v6722_v63, %v5601_v3 }
 0x278   : > { %v3241_v23 = vmul.f32 %v3234_v31, %v6647_v37 }
 0x279   : > { %3825 = vmatpush1.bf16.msra.mxu0 %v5159_v55  ;;  %v3186_v55 = vmul.f32 %v3182_v33, %v6642_v51  ;;  %v3270_v3 = vmul.f32 %v3266_v41, %v6655_v46 }
 0x27a   : > { %3826 = vmatprep.subr.bf16.mxu0 %v5164_v35  ;;  %4534 = vmatpush3.bf16.msra.mxu1 %v5177_v40  ;;  %v3238_v35 = vrot.slane %v6722_v63, %v5610_v6 }
 0x27b   : > { %4535 = vmatprep.subr.bf16.mxu1 %v5178_v49  ;;  %v3269_v49 = vmul.f32 %v3262_v54, %v6655_v46  ;;  %v3348_v46 = vrot.slane %v6706_v19, %v5612_v7  ;;  %v5188_v7 = vld [vmem:[%s6855_s9 + $0x78] sm:$0xff]  }
 0x27c   : > { %v3242_v6 = vmul.f32 %v3238_v35, %v6647_v37 }
 0x27d   : > { %3827 = vmatpush1.bf16.msra.mxu0 %v5162_v21 }
 0x27e   : > { %3828 = vmatprep.subr.bf16.mxu0 %v5167_v8  ;;  %4536 = vmatpush3.bf16.msra.mxu1 %v5179_v59  ;;  %v3213_v8 = vmul.f32 %v3206_v24, %v6645_v45  ;;  %v3322_v59 = vrot.slane %v6722_v63, %v5618_v10 }
 0x27f   : > { %4537 = vmatprep.subr.bf16.mxu1 %v5180_v12 }
 0x281   : > { %3829 = vmatpush1.bf16.msra.mxu0 %v5165_v15 }
 0x282   : > { %3830 = vmatprep.subr.bf16.mxu0 %v5170_v32  ;;  %4538 = vmatpush3.bf16.msra.mxu1 %v5181_v25  ;;  %v3214_v32 = vmul.f32 %v3210_v57, %v6645_v45  ;;  %v3318_v45 = vrot.slane %v6717_v16, %v5618_v10 }
 0x283   : > { %4539 = vmatprep.subr.bf16.mxu1 %v5182_v61 }
 0x285   : > { %3831 = vmatpush1.bf16.msra.mxu0 %v5168_v17 }
 0x286   : > { %3832 = vmatprep.subr.bf16.mxu0 %v5173_v34  ;;  %4540 = vmatpush3.bf16.msra.mxu1 %v5183_v29  ;;  %v3294_v34 = vrot.slane %v6722_v63, %v5620_v11 }
 0x287   : > { %4541 = vmatprep.subr.bf16.mxu1 %v5184_v38 }
 0x288   : > { %v3298_v37 = vmul.f32 %v3294_v34, %v6679_v20 }
 0x289   : > { %3833 = vmatpush1.bf16.msra.mxu0 %v5171_v62 }
 0x28a   : > { %4542 = vmatpush3.bf16.msra.mxu1 %v5185_v2  ;;  %v3344_v2 = vrot.slane %v6706_v19, %v5616_v9  ;;  %v5186_v9 = vld [vmem:[%s6855_s9 + $0x70] sm:$0xff]   ;;  %v5189_v19 = vld [vmem:[%s6855_s9 + $0x38] sm:$0xff]  }
 0x28b   : > { %4543 = vmatprep.subr.bf16.mxu1 %v5186_v9 }
 0x2b1   : > { %v3046_v1 = vpop.f32.mrb[16].mxu1 }
 0x2b2   : > { %v3047_v50 = vadd.f32 %v3046_v1, %v3006_v27  ;;  %v3048_v47 = vpop.f32.mrb[17].mxu1 }
 0x2b3   : > { %v3049_v18 = vadd.f32 %v3048_v47, %v3008_v28  ;;  %v3050_v5 = vpop.f32.mrb[18].mxu1  ;;  %v3185_v28 = vmul.f32 %v3178_v52, %v6642_v51  ;;  %v3290_v51 = vrot.slane %v6717_v16, %v5620_v11  ;;  %v3325_v11 = vmul.f32 %v3318_v45, %v6699_v48 }
 0x2b4   : > { %v3051_v26 = vpop.f32.mrb[19].mxu1  ;;  %v3088_v30 = vadd.f32 %v6730_v53, %v3047_v50  ;;  %v3326_v16 = vmul.f32 %v3322_v59, %v6699_v48  ;;  %v5187_v48 = vld [vmem:[%s6855_s9 + $0x30] sm:$0xff]  }
 0x2b5   : > { %v3090_v56 = vadd.f32 %v3089_v44, %v3049_v18  ;;  %v3297_v25 = vmul.f32 %v3290_v51, %v6679_v20  ;;  %4544 = vmatpush3.bf16.msra.mxu1 %v5187_v48 }
 0x2b6   : > { %4545 = vmatprep.subr.bf16.mxu1 %v5188_v7 }
 0x2b9   : > { %4546 = vmatpush3.bf16.msra.mxu1 %v5189_v19 }
 0x2f1   : > { %v3128_v14 = vpop.f32.mrb[20].mxu1 }
 0x2f2   : > { %v3129_v53 = vadd.f32 %v3128_v14, %v3088_v30  ;;  %v3130_v44 = vpop.f32.mrb[21].mxu1  ;;  %v3429_v30 = vld [vmem:[%s6854_s8] sm:$0x3] }
 0x2f3   : > { %v3131_v27 = vadd.f32 %v3130_v44, %v3090_v56  ;;  %v3132_v39 = vpop.f32.mrb[22].mxu1  ;;  %v3434_v56 = vrot.slane %v3429_v30, %v5603_v4  ;;  %v3438_v13 = vrot.slane %v3429_v30, %v5589_v0  ;;  %v4511_v4 = vld [vmem:[%s6856_s10] ss:$0 sm:$0xff] }
 0x2f4   : > { %v3161_v36 = vadd.f32 %v3157_v58, %v3129_v53  ;;  %v3133_v43 = vpop.f32.mrb[23].mxu1 }
 0x2f5   : > { %v3162_v21 = vadd.f32 %v3158_v22, %v3131_v27 }
 0x2f6   : > { %v3189_v15 = vadd.f32 %v3185_v28, %v3161_v36 }
 0x2f7   : > { %v3190_v60 = vadd.f32 %v3186_v55, %v3162_v21  ;;  %v6874_v21 = vlaneseq }
 0x2f8   : > { %v3217_v17 = vadd.f32 %v3213_v8, %v3189_v15 }
 0x2f9   : > { %v3218_v40 = vadd.f32 %v3214_v32, %v3190_v60  ;;  %v4023_v8 = vand.u32 127, %v6874_v21 }
 0x2fa   : > { %v3245_v62 = vadd.f32 %v3241_v23, %v3217_v17 }
 0x2fb   : > { %v3246_v12 = vadd.f32 %v3242_v6, %v3218_v40  ;;  %vm4024_vm0 = vcmp.ge.s32.totalorder %v4023_v8, 2  ;;  %vm4025_vm1 = vcmp.lt.s32.totalorder %v4023_v8, 7 }
 0x2fc   : > { %v3273_v61 = vadd.f32 %v3269_v49, %v3245_v62  ;;  %vm4026_vm2 = vmand %vm4024_vm0, %vm4025_vm1 }
 0x2fd   : > { %v3274_v29 = vadd.f32 %v3270_v3, %v3246_v12 }
 0x2fe   : > { %v3301_v38 = vadd.f32 %v3297_v25, %v3273_v61 }
 0x2ff   : > { %v3302_v1 = vadd.f32 %v3298_v37, %v3274_v29 }
 0x300   : > { %v3329_v10 = vadd.f32 %v3325_v11, %v3301_v38 }
 0x301   : > { %v3330_v63 = vadd.f32 %v3326_v16, %v3302_v1 }
 0x302   : > { %v3355_v50 = vadd.f32 %v3344_v2, %v3329_v10 }
 0x303   : > { %v3356_v47 = vadd.f32 %v3348_v46, %v3330_v63 }
 0x304   : > { %v3359_v18 = vmax.f32 %v3355_v50, 0.0 }
 0x305   : > { %v3360_v5 = vmax.f32 %v3356_v47, 0.0 }
 0x306   : > { %v3363_v26 = vpack.c.bf16 %v3359_v18, %v3359_v18 }
 0x307   : > { %v3364_v20 = vpack.c.bf16 %v3360_v5, %v3360_v5 }
 0x309   : > { %3834 = vmatprep.mubr.bf16.mxu0 %v3364_v20 }
 0x30a   : > { %3835 = vmatmul.mubr.bf16.vlgmr.msra.gmra.mrb[16].mxu0 %v3363_v26 }
 0x3dd   : > { %v3836_v42 = vpop.f32.mrb[16].mxu0 }
 0x3de   : > { %v4553_v52 = vadd.f32 %v3836_v42, %v3434_v56  ;;  %v3838_v33 = vpop.f32.mrb[17].mxu0 }
 0x3df   : > { %v4554_v14 = vadd.f32 %v3838_v33, %v3438_v13  ;;  %v3840_v24 = vpop.f32.mrb[18].mxu0 }
 0x3e0   : > { %v3843_v58 = vmax.f32 %v4553_v52, 0.0  ;;  %v3841_v53 = vpop.f32.mrb[19].mxu0 }
 0x3e1   : > { %v3844_v44 = vmax.f32 %v4554_v14, 0.0 }
 0x3e2   : > { %v3845_v22 = vpack.c.bf16 %v3843_v58, %v3843_v58 }
 0x3e3   : > { %v3846_v57 = vpack.c.bf16 %v3844_v44, %v3844_v44 }
 0x3e5   : > { %4014 = vmatprep.mubr.bf16.mxu1 %v3846_v57 }
 0x3e6   : > { %4015 = vmatmul.mubr.bf16.vlgmr.msra.gmra.mrb[24].mxu1 %v3845_v22 }
 0x4b9   : > { %v4547_v27 = vpop.f32.mrb[24].mxu1 }
 0x4ba   : > { %v4548_v39 = vpop.f32.mrb[25].mxu1 }
 0x4bb   : > { %v4549_v0 = vadd.f32 %v4548_v39, %v4547_v27  ;;  %v4550_v28 = vpop.f32.mrb[26].mxu1 }
 0x4bc   : > { %v4551_v31 = vpop.f32.mrb[27].mxu1 }
 0x4bd   : > { %v4017_v36 = vadd.f32 %v4549_v0, %v4511_v4 }
 0x4bf   : > { %v4528_v43 = vmul.f32 -1.442695, %v4017_v36 }
 0x4c1   : > { %5190 = vpow2.f32 %v4528_v43 }
 0x4cb   : > { %v5191_v55 = vpop.eup %5190 }
 0x4cc   : > { %v4030_v35 = vadd.f32 1.0, %v5191_v55 }
 0x4ce   : > { %5192 = vrcp.f32 %v4030_v35 }
 0x4d8   : > { %v5193_v54 = vpop.eup %5192 }
 0x4d9   : > { %v4033_v15 = vsel %vm4026_vm2, %v5193_v54, %v4017_v36 }
 0x4da   : > { %4034 = vst [vmem:[%s416_s30] sm:$0xff] %v4033_v15 }
 0x4db PF: > { %s22_s17 = sadd.s32 1, %s5233_s17  }
 0x4dc   : > { %p19_p3 = scmp.ge.s32.totalorder %s22_s17, 4  }
 0x4de   :  { %21 = sbr.rel (!%p19_p3) target bundleno = 1 (0x1), region = 107 }
 0x4e5   :  { %4054 = vsyncpa [#allocation3], 1 }
 0x4e6   :  { %4056 = vsyncpa [#allocation3 + $0x1], 1 }

</bundles_post_ra>
